<compile_context>
chip_gen: v7x
topology: tpu7x:2x2x1
jax: 0.10.0
libtpu: 0.0.40
codegen_flags: <defaults>
</compile_context>

<pallas_src>
import functools

import jax
import jax.numpy as jnp
from jax.experimental import pallas as pl
from jax.experimental.pallas import tpu as pltpu

LANE = 128
SUBLANE = 8


def _round_up(x, m):
    return (x + m - 1) // m * m


def _pad2(a, rows, cols, value=0.0):
    r, c = a.shape
    return jnp.pad(a, ((0, rows - r), (0, cols - c)), constant_values=value)


# ----------------------------- fused kernel --------------------------------

def fused_vsr_kernel(x_ref, w_fe_ref, b_fe_ref, ln_g_ref, ln_b_ref,
                     w1_ref, b1_ref, w2_ref, b2_ref, w_ctc_ref, b_ctc_ref,
                     logp_ref, h_ref, *, d_real):
    """frontend -> encoder block -> CTC log-softmax, h resident in VMEM scratch.

    All padded lanes of the hidden dim are exactly zero by construction
    (zero-padded weights/biases/gamma), so only the LayerNorm variance needs an
    explicit lane mask.
    """
    # ---- stage 1: visual frontend (per-frame patch embedding + ReLU) ------
    y = jnp.dot(x_ref[...], w_fe_ref[...], preferred_element_type=jnp.float32)
    h_ref[...] = jnp.maximum(y + b_fe_ref[...], 0.0)

    # ---- stage 2: encoder block: LayerNorm -> FFN (D -> 4D -> D) -> residual
    h = h_ref[...]
    lane_ok = jax.lax.broadcasted_iota(jnp.int32, h.shape, 1) < d_real
    inv_d = 1.0 / d_real
    mu = jnp.sum(h, axis=-1, keepdims=True) * inv_d          # pads are zero
    centered = jnp.where(lane_ok, h - mu, 0.0)
    var = jnp.sum(centered * centered, axis=-1, keepdims=True) * inv_d
    hn = centered * jax.lax.rsqrt(var + 1e-5)
    hn = hn * ln_g_ref[...] + ln_b_ref[...]                   # pads stay zero

    f = jnp.dot(hn.astype(w1_ref.dtype), w1_ref[...],
                preferred_element_type=jnp.float32) + b1_ref[...]
    f = jnp.maximum(f, 0.0)
    f = jnp.dot(f.astype(w2_ref.dtype), w2_ref[...],
                preferred_element_type=jnp.float32) + b2_ref[...]
    h_ref[...] = h + f

    # ---- stage 3: CTC head: projection + log-softmax (lane-dense output) ---
    logits = jnp.dot(h_ref[...].astype(w_ctc_ref.dtype), w_ctc_ref[...],
                     preferred_element_type=jnp.float32) + b_ctc_ref[...]
    m = jnp.max(logits, axis=-1, keepdims=True)
    lse = jnp.log(jnp.sum(jnp.exp(logits - m), axis=-1, keepdims=True)) + m
    logp_ref[...] = logits - lse


# ----------------------------- wrapper --------------------------------------

def infer(video, params, *, min_rows=128):
    """video: [B, T, C, H, W] float32 (NCHW frames, torch convention).

    Returns (logp [B*T, V] float32, greedy tokens [B*T] int32).
    """
    B, T, C, H, W = video.shape
    N = B * T
    F = C * H * W
    D = params["w_fe"].shape[1]
    FF = params["w1"].shape[1]
    V = params["w_ctc"].shape[1]

    # pad every axis to hardware-friendly sizes (lane=128, sublane=8); fill the
    # MXU M dimension to >=128 rows so the matmuls run full-height passes.
    Np = max(min_rows, _round_up(N, SUBLANE))
    Fp = _round_up(F, LANE)
    Dp = _round_up(D, LANE)
    FFp = _round_up(FF, LANE)
    Vp = _round_up(V, LANE)

    x_rows = video.reshape(N, F)                              # glue: flatten frames
    x_p = _pad2(x_rows, Np, Fp).astype(jnp.bfloat16)

    # bf16 matmul operands, f32 everything elementwise; zero-padding keeps the
    # padded hidden lanes identically zero through the whole pipeline.
    w_fe = _pad2(params["w_fe"], Fp, Dp).astype(jnp.bfloat16)
    b_fe = _pad2(params["b_fe"], 1, Dp)
    ln_g = _pad2(params["ln_g"], 1, Dp)
    ln_b = _pad2(params["ln_b"], 1, Dp)
    w1 = _pad2(params["w1"], Dp, FFp).astype(jnp.bfloat16)
    b1 = _pad2(params["b1"], 1, FFp)
    w2 = _pad2(params["w2"], FFp, Dp).astype(jnp.bfloat16)
    b2 = _pad2(params["b2"], 1, Dp)
    w_ctc = _pad2(params["w_ctc"], Dp, Vp).astype(jnp.bfloat16)
    # padded vocab lanes get a huge negative bias -> ~0 probability mass,
    # so log-softmax over 128 lanes == log-softmax over the real V lanes.
    b_ctc = _pad2(params["b_ctc"], 1, Vp, value=-1e30)

    vspec = pl.BlockSpec(memory_space=pltpu.VMEM)
    kernel = functools.partial(fused_vsr_kernel, d_real=D)

    # TODO(synk): at realistic VSR sizes (T~hundreds, D=512, V~1000s) add a row
    # grid with (>=512, feature) tiles, constant-index weight BlockSpecs and
    # dimension_semantics=("parallel",) so v7x's two TensorCores split the rows.
    logp_pad = pl.pallas_call(
        kernel,
        out_shape=jax.ShapeDtypeStruct((Np, Vp), jnp.float32),
        in_specs=[vspec] * 11,
        out_specs=vspec,
        scratch_shapes=[pltpu.VMEM((Np, Dp), jnp.float32)],
        compiler_params=pltpu.CompilerParams(vmem_limit_bytes=32 << 20),
    )(x_p, w_fe, b_fe, ln_g, ln_b, w1, b1, w2, b2, w_ctc, b_ctc)

    logp = logp_pad[:N, :V]
    toks = jnp.argmax(logp, axis=-1).astype(jnp.int32)  # greedy per-frame tokens
    return logp, toks


def ctc_greedy_collapse(token_ids, blank=0):
    # host-side glue: collapse repeats then drop blanks (greedy CTC decode)
    # TODO(synk): beam search with RNN-LM fusion (penalty/ctc_weight/lm_weight)
    # has no clean Pallas equivalent; greedy decode is used instead.
    out, prev = [], None
    for t in token_ids:
        t = int(t)
        if t != prev and t != blank:
            out.append(t)
        prev = t
    return out


# ------------------------------- main ---------------------------------------

if __name__ == "__main__":
    key = jax.random.PRNGKey(0)
    kx, k1, k2, k3, k4 = jax.random.split(key, 5)

    # small shapes: B=1 clip, T=8 frames, grayscale 16x16 mouth crops
    B, T, C, H, W = 1, 8, 1, 16, 16
    F = C * H * W          # 256 flattened frame features
    D = 32                 # encoder hidden
    FF = 4 * D             # 128 feed-forward
    V = 40                 # CTC vocab (index 0 = blank)

    video = jax.random.normal(kx, (B, T, C, H, W), dtype=jnp.float32)

    params = {
        "w_fe": jax.random.normal(k1, (F, D), jnp.float32) * 0.05,
        "b_fe": jnp.zeros((1, D), jnp.float32),
        "ln_g": jnp.ones((1, D), jnp.float32),
        "ln_b": jnp.zeros((1, D), jnp.float32),
        "w1":   jax.random.normal(k2, (D, FF), jnp.float32) * 0.1,
        "b1":   jnp.zeros((1, FF), jnp.float32),
        "w2":   jax.random.normal(k3, (FF, D), jnp.float32) * 0.1,
        "b2":   jnp.zeros((1, D), jnp.float32),
        "w_ctc": jax.random.normal(k4, (D, V), jnp.float32) * 0.1,
        "b_ctc": jnp.zeros((1, V), jnp.float32),
    }

    logp, toks = jax.block_until_ready(infer(video, params))

    assert logp.shape == (B * T, V) and toks.shape == (B * T,)
    assert bool(jnp.all(jnp.isfinite(logp)))
    # log-softmax rows must sum to ~1 in prob space (real vocab carries all mass)
    assert bool(jnp.allclose(jnp.sum(jnp.exp(logp), axis=-1), 1.0, atol=1e-4))

    transcript_ids = ctc_greedy_collapse(jax.device_get(toks).tolist())
    _ = transcript_ids  # "transcript" of the synthetic clip (token IDs)

    print("KERNEL_OK")
</pallas_src>

<mosaic_0001>
module attributes {stable_mosaic.version = 11 : i64} {
  func.func @fused_vsr_kernel(%arg0: memref<128x256xbf16, #tpu.memory_space<vmem>>, %arg1: memref<256x128xbf16, #tpu.memory_space<vmem>>, %arg2: memref<1x128xf32, #tpu.memory_space<vmem>>, %arg3: memref<1x128xf32, #tpu.memory_space<vmem>>, %arg4: memref<1x128xf32, #tpu.memory_space<vmem>>, %arg5: memref<128x128xbf16, #tpu.memory_space<vmem>>, %arg6: memref<1x128xf32, #tpu.memory_space<vmem>>, %arg7: memref<128x128xbf16, #tpu.memory_space<vmem>>, %arg8: memref<1x128xf32, #tpu.memory_space<vmem>>, %arg9: memref<128x128xbf16, #tpu.memory_space<vmem>>, %arg10: memref<1x128xf32, #tpu.memory_space<vmem>>, %arg11: memref<128x128xf32, #tpu.memory_space<vmem>>, %arg12: memref<128x128xf32, #tpu.memory_space<vmem>>) attributes {dimension_semantics = [], scalar_prefetch = 0 : i64, scratch_operands = 1 : i64, tpu.core_type = #tpu.core_type<tc>} {
    %c0 = arith.constant 0 : index
    %c0_0 = arith.constant 0 : index
    %0 = vector.load %arg0[%c0, %c0_0] : memref<128x256xbf16, #tpu.memory_space<vmem>>, vector<128x256xbf16>
    %c0_1 = arith.constant 0 : index
    %c0_2 = arith.constant 0 : index
    %1 = vector.load %arg1[%c0_1, %c0_2] : memref<256x128xbf16, #tpu.memory_space<vmem>>, vector<256x128xbf16>
    %cst = arith.constant dense<0.000000e+00> : vector<128x128xf32>
    %2 = tpu.matmul %0, %1, %cst {dimension_numbers = #tpu.dot_dimension_numbers<[1], [0], [0], [1], [0, 0, 1, 1], [], []>} : vector<128x256xbf16>, vector<256x128xbf16>, vector<128x128xf32> -> vector<128x128xf32>
    %c0_3 = arith.constant 0 : index
    %c0_4 = arith.constant 0 : index
    %3 = vector.load %arg2[%c0_3, %c0_4] : memref<1x128xf32, #tpu.memory_space<vmem>>, vector<1x128xf32>
    %4 = vector.broadcast %3 : vector<1x128xf32> to vector<128x128xf32>
    %5 = arith.addf %2, %4 : vector<128x128xf32>
    %cst_5 = arith.constant 0.000000e+00 : f32
    %6 = vector.broadcast %cst_5 : f32 to vector<128x128xf32>
    %7 = arith.maximumf %5, %6 : vector<128x128xf32>
    %c0_6 = arith.constant 0 : index
    %c0_7 = arith.constant 0 : index
    %8 = vector.load %arg12[%c0_6, %c0_7] : memref<128x128xf32, #tpu.memory_space<vmem>>, vector<128x128xf32>
    tpu.vector_store %arg12[%c0_6, %c0_7], %7 {strides = array<i32>} : memref<128x128xf32, #tpu.memory_space<vmem>>, vector<128x128xf32>,
    %c0_8 = arith.constant 0 : index
    %c0_9 = arith.constant 0 : index
    %9 = vector.load %arg12[%c0_8, %c0_9] : memref<128x128xf32, #tpu.memory_space<vmem>>, vector<128x128xf32>
    %10 = tpu.iota {dimensions = array<i32: 1>} : vector<128x128xi32>
    %c32_i32 = arith.constant 32 : i32
    %11 = vector.broadcast %c32_i32 : i32 to vector<128x128xi32>
    %12 = arith.cmpi slt, %10, %11 : vector<128x128xi32>
    %cst_10 = arith.constant dense<0.000000e+00> : vector<128xf32>
    %13 = vector.multi_reduction <add>, %9, %cst_10 [1] : vector<128x128xf32> to vector<128xf32>
    %14 = vector.shape_cast %13 : vector<128xf32> to vector<128x1xf32>
    %cst_11 = arith.constant 3.125000e-02 : f32
    %15 = vector.broadcast %cst_11 : f32 to vector<128x1xf32>
    %16 = arith.mulf %14, %15 : vector<128x1xf32>
    %17 = vector.broadcast %16 : vector<128x1xf32> to vector<128x128xf32>
    %18 = arith.subf %9, %17 : vector<128x128xf32>
    %cst_12 = arith.constant 0.000000e+00 : f32
    %19 = vector.broadcast %cst_12 : f32 to vector<128x128xf32>
    %20 = arith.select %12, %18, %19 : vector<128x128xi1>, vector<128x128xf32>
    %21 = arith.mulf %20, %20 : vector<128x128xf32>
    %cst_13 = arith.constant dense<0.000000e+00> : vector<128xf32>
    %22 = vector.multi_reduction <add>, %21, %cst_13 [1] : vector<128x128xf32> to vector<128xf32>
    %23 = vector.shape_cast %22 : vector<128xf32> to vector<128x1xf32>
    %cst_14 = arith.constant 3.125000e-02 : f32
    %24 = vector.broadcast %cst_14 : f32 to vector<128x1xf32>
    %25 = arith.mulf %23, %24 : vector<128x1xf32>
    %cst_15 = arith.constant 9.99999974E-6 : f32
    %26 = vector.broadcast %cst_15 : f32 to vector<128x1xf32>
    %27 = arith.addf %25, %26 : vector<128x1xf32>
    %28 = math.rsqrt %27 : vector<128x1xf32>
    %29 = vector.broadcast %28 : vector<128x1xf32> to vector<128x128xf32>
    %30 = arith.mulf %20, %29 : vector<128x128xf32>
    %c0_16 = arith.constant 0 : index
    %c0_17 = arith.constant 0 : index
    %31 = vector.load %arg3[%c0_16, %c0_17] : memref<1x128xf32, #tpu.memory_space<vmem>>, vector<1x128xf32>
    %32 = vector.broadcast %31 : vector<1x128xf32> to vector<128x128xf32>
    %33 = arith.mulf %30, %32 : vector<128x128xf32>
    %c0_18 = arith.constant 0 : index
    %c0_19 = arith.constant 0 : index
    %34 = vector.load %arg4[%c0_18, %c0_19] : memref<1x128xf32, #tpu.memory_space<vmem>>, vector<1x128xf32>
    %35 = vector.broadcast %34 : vector<1x128xf32> to vector<128x128xf32>
    %36 = arith.addf %33, %35 : vector<128x128xf32>
    %37 = arith.truncf %36 : vector<128x128xf32> to vector<128x128xbf16>
    %c0_20 = arith.constant 0 : index
    %c0_21 = arith.constant 0 : index
    %38 = vector.load %arg5[%c0_20, %c0_21] : memref<128x128xbf16, #tpu.memory_space<vmem>>, vector<128x128xbf16>
    %cst_22 = arith.constant dense<0.000000e+00> : vector<128x128xf32>
    %39 = tpu.matmul %37, %38, %cst_22 {dimension_numbers = #tpu.dot_dimension_numbers<[1], [0], [0], [1], [0, 0, 1, 1], [], []>} : vector<128x128xbf16>, vector<128x128xbf16>, vector<128x128xf32> -> vector<128x128xf32>
    %c0_23 = arith.constant 0 : index
    %c0_24 = arith.constant 0 : index
    %40 = vector.load %arg6[%c0_23, %c0_24] : memref<1x128xf32, #tpu.memory_space<vmem>>, vector<1x128xf32>
    %41 = vector.broadcast %40 : vector<1x128xf32> to vector<128x128xf32>
    %42 = arith.addf %39, %41 : vector<128x128xf32>
    %cst_25 = arith.constant 0.000000e+00 : f32
    %43 = vector.broadcast %cst_25 : f32 to vector<128x128xf32>
    %44 = arith.maximumf %42, %43 : vector<128x128xf32>
    %45 = arith.truncf %44 : vector<128x128xf32> to vector<128x128xbf16>
    %c0_26 = arith.constant 0 : index
    %c0_27 = arith.constant 0 : index
    %46 = vector.load %arg7[%c0_26, %c0_27] : memref<128x128xbf16, #tpu.memory_space<vmem>>, vector<128x128xbf16>
    %cst_28 = arith.constant dense<0.000000e+00> : vector<128x128xf32>
    %47 = tpu.matmul %45, %46, %cst_28 {dimension_numbers = #tpu.dot_dimension_numbers<[1], [0], [0], [1], [0, 0, 1, 1], [], []>} : vector<128x128xbf16>, vector<128x128xbf16>, vector<128x128xf32> -> vector<128x128xf32>
    %c0_29 = arith.constant 0 : index
    %c0_30 = arith.constant 0 : index
    %48 = vector.load %arg8[%c0_29, %c0_30] : memref<1x128xf32, #tpu.memory_space<vmem>>, vector<1x128xf32>
    %49 = vector.broadcast %48 : vector<1x128xf32> to vector<128x128xf32>
    %50 = arith.addf %47, %49 : vector<128x128xf32>
    %51 = arith.addf %9, %50 : vector<128x128xf32>
    %c0_31 = arith.constant 0 : index
    %c0_32 = arith.constant 0 : index
    %52 = vector.load %arg12[%c0_31, %c0_32] : memref<128x128xf32, #tpu.memory_space<vmem>>, vector<128x128xf32>
    tpu.vector_store %arg12[%c0_31, %c0_32], %51 {strides = array<i32>} : memref<128x128xf32, #tpu.memory_space<vmem>>, vector<128x128xf32>,
    %c0_33 = arith.constant 0 : index
    %c0_34 = arith.constant 0 : index
    %53 = vector.load %arg12[%c0_33, %c0_34] : memref<128x128xf32, #tpu.memory_space<vmem>>, vector<128x128xf32>
    %54 = arith.truncf %53 : vector<128x128xf32> to vector<128x128xbf16>
    %c0_35 = arith.constant 0 : index
    %c0_36 = arith.constant 0 : index
    %55 = vector.load %arg9[%c0_35, %c0_36] : memref<128x128xbf16, #tpu.memory_space<vmem>>, vector<128x128xbf16>
    %cst_37 = arith.constant dense<0.000000e+00> : vector<128x128xf32>
    %56 = tpu.matmul %54, %55, %cst_37 {dimension_numbers = #tpu.dot_dimension_numbers<[1], [0], [0], [1], [0, 0, 1, 1], [], []>} : vector<128x128xbf16>, vector<128x128xbf16>, vector<128x128xf32> -> vector<128x128xf32>
    %c0_38 = arith.constant 0 : index
    %c0_39 = arith.constant 0 : index
    %57 = vector.load %arg10[%c0_38, %c0_39] : memref<1x128xf32, #tpu.memory_space<vmem>>, vector<1x128xf32>
    %58 = vector.broadcast %57 : vector<1x128xf32> to vector<128x128xf32>
    %59 = arith.addf %56, %58 : vector<128x128xf32>
    %cst_40 = arith.constant dense<0xFF800000> : vector<128xf32>
    %60 = vector.multi_reduction <maximumf>, %59, %cst_40 [1] : vector<128x128xf32> to vector<128xf32>
    %61 = vector.shape_cast %60 : vector<128xf32> to vector<128x1xf32>
    %62 = vector.broadcast %61 : vector<128x1xf32> to vector<128x128xf32>
    %63 = arith.subf %59, %62 : vector<128x128xf32>
    %64 = math.exp %63 : vector<128x128xf32>
    %cst_41 = arith.constant dense<0.000000e+00> : vector<128xf32>
    %65 = vector.multi_reduction <add>, %64, %cst_41 [1] : vector<128x128xf32> to vector<128xf32>
    %66 = vector.shape_cast %65 : vector<128xf32> to vector<128x1xf32>
    %67 = math.log %66 : vector<128x1xf32>
    %68 = arith.addf %67, %61 : vector<128x1xf32>
    %69 = vector.broadcast %68 : vector<128x1xf32> to vector<128x128xf32>
    %70 = arith.subf %59, %69 : vector<128x128xf32>
    %c0_42 = arith.constant 0 : index
    %c0_43 = arith.constant 0 : index
    %71 = vector.load %arg11[%c0_42, %c0_43] : memref<128x128xf32, #tpu.memory_space<vmem>>, vector<128x128xf32>
    tpu.vector_store %arg11[%c0_42, %c0_43], %70 {strides = array<i32>} : memref<128x128xf32, #tpu.memory_space<vmem>>, vector<128x128xf32>,
    return
  }
}

</mosaic_0001>

<bundles_post_ra>
// kernel: tpu_custom_call.1
= control target key start
LH: loop header
LB: loop body
LE: loop exit
PB: predicated region body
PF: predicated region fallthrough
CT: control target
= control target key end

     0   :  { %16 = vsyncpa [#allocation4], 0  ;;  %s2717_s0 = inlined_call_operand.hbm [shape: bf16[128,256], index: 0, kind: input, shape index: {}]   ;;  %s2718_s1 = inlined_call_operand.hbm [shape: bf16[256,128], index: 1, kind: input, shape index: {}]   ;;  %s2719_s2 = inlined_call_operand.vmem [shape: f32[1,128], index: 2, kind: input, shape index: {}]   ;;  %s2720_s3 = inlined_call_operand.vmem [shape: f32[1,128], index: 3, kind: input, shape index: {}]   ;;  %s2721_s4 = inlined_call_operand.vmem [shape: f32[1,128], index: 4, kind: input, shape index: {}]   ;;  %s2722_s5 = inlined_call_operand.hbm [shape: bf16[128,128], index: 5, kind: input, shape index: {}]   ;;  %s2723_s6 = inlined_call_operand.vmem [shape: f32[1,128], index: 6, kind: input, shape index: {}]   ;;  %s2724_s7 = inlined_call_operand.hbm [shape: bf16[128,128], index: 7, kind: input, shape index: {}]   ;;  %s2725_s8 = inlined_call_operand.vmem [shape: f32[1,128], index: 8, kind: input, shape index: {}]   ;;  %s2726_s9 = inlined_call_operand.hbm [shape: bf16[128,128], index: 9, kind: input, shape index: {}]   ;;  %s2727_s10 = inlined_call_operand.vmem [shape: f32[1,128], index: 10, kind: input, shape index: {}]   ;;  %s2728_s11 = inlined_call_operand.hbm [shape: f32[128,128], index: 11, kind: output, shape index: {}]  }
   0x1   :  { %17 = vsyncpa [#allocation7], 0 }
   0x2   :  { %18 = vsyncpa [#allocation10], 0 }
   0x3   :  { %19 = vsyncpa [#allocation5], 0  ;;  %s2124_s17 = smov [#allocation6]   ;;  %s1984_s21 = scalar_lea.hbm %s2718_s1, 2048 }
   0x4   :  { %s37_s18 = sshll.u32 %s2124_s17, 4  ;;  %p1985_p0 = scmp.ne.s32.totalorder %s2718_s1, %s1984_s21  ;;  %s38_s18 = int_to_ptr.vmem [resolvable:$true] %s37_s18 }
   0x5   :  { %p1988_p1 = scmp.lt.u32.totalorder %s1984_s21, %s2718_s1 }
   0x7   :  { %p1990_p2 = pnand %p1988_p1, %p1985_p0 }
   0x9   :  { %1993 = shalt.err (!%p1990_p2)
}
   0xa   :  { %s1994_s26 = scalar_lea.vmem %s38_s18, 2048  ;;  %p1999_p4 = scmp.lt.s32.totalorder %s38_s18, %s38_s18 }
   0xb   :  { %p1995_p3 = scmp.ne.s32.totalorder %s38_s18, %s1994_s26  ;;  %p2000_p5 = scmp.lt.s32.totalorder %s1994_s26, %s1994_s26 }
   0xd   :  { %p2001_p6 = por %p2000_p5, %p1999_p4 }
   0xf   :  { %p2002_p7 = pnand %p2001_p6, %p1995_p3 }
  0x11   :  { %2005 = shalt.err (!%p2002_p7)
}
  0x12   :  { %s2125_s27 = smov 64   ;;  %s2126_s28 = smov 4  }
  0x13   :  { %43 = dma.hbm_to_vmem [thread:$0]  %s2718_s1, 2048, %s38_s18, [#allocation7], %s2125_s27, %s2125_s27, %s2126_s28  }
  0x14   :  { %s2127_s12 = smov [#allocation9]   ;;  %s2128_s14 = smov [#allocation3]  }
  0x15   :  { %s69_s13 = sshll.u32 %s2127_s12, 4  ;;  %s25_s15 = sshll.u32 %s2128_s14, 4  ;;  %s70_s13 = int_to_ptr.vmem [resolvable:$true] %s69_s13  ;;  %s26_s15 = int_to_ptr.vmem [resolvable:$true] %s25_s15 }
  0x16   :  { %s2006_s19 = scalar_lea.hbm %s2724_s7, 1024 }
  0x17   :  { %p2007_p8 = scmp.ne.s32.totalorder %s2724_s7, %s2006_s19  ;;  %p2010_p9 = scmp.lt.u32.totalorder %s2006_s19, %s2724_s7 }
  0x19   :  { %p2012_p10 = pnand %p2010_p9, %p2007_p8 }
  0x1b   :  { %2015 = shalt.err (!%p2012_p10)
}
  0x1c   :  { %s2016_s1 = scalar_lea.vmem %s70_s13, 1024  ;;  %p2021_p12 = scmp.lt.s32.totalorder %s70_s13, %s70_s13 }
  0x1d   :  { %p2017_p11 = scmp.ne.s32.totalorder %s70_s13, %s2016_s1  ;;  %p2022_p13 = scmp.lt.s32.totalorder %s2016_s1, %s2016_s1 }
  0x1f   :  { %p2023_p0 = por %p2022_p13, %p2021_p12 }
  0x21   :  { %p2024_p1 = pnand %p2023_p0, %p2017_p11 }
  0x23   :  { %2027 = shalt.err (!%p2024_p1)
}
  0x24   :  { %75 = dma.hbm_to_vmem [thread:$0]  %s2724_s7, 1024, %s70_s13, [#allocation10], %s2125_s27, %s2125_s27, %s2126_s28  }
  0x25   :  { %s2028_s29 = scalar_lea.hbm %s2717_s0, 2048 }
  0x26   :  { %p2029_p2 = scmp.ne.s32.totalorder %s2717_s0, %s2028_s29  ;;  %p2032_p3 = scmp.lt.u32.totalorder %s2028_s29, %s2717_s0 }
  0x28   :  { %p2034_p4 = pnand %p2032_p3, %p2029_p2 }
  0x2a   :  { %2037 = shalt.err (!%p2034_p4)
}
  0x2b   :  { %s2038_s17 = scalar_lea.vmem %s26_s15, 2048  ;;  %p2043_p6 = scmp.lt.s32.totalorder %s26_s15, %s26_s15 }
  0x2c   :  { %p2039_p5 = scmp.ne.s32.totalorder %s26_s15, %s2038_s17  ;;  %p2044_p7 = scmp.lt.s32.totalorder %s2038_s17, %s2038_s17 }
  0x2e   :  { %p2045_p8 = por %p2044_p7, %p2043_p6 }
  0x30   :  { %p2046_p9 = pnand %p2045_p8, %p2039_p5 }
  0x32   :  { %2049 = shalt.err (!%p2046_p9)
}
  0x33   :  { %s2129_s7 = smov 128   ;;  %s2130_s13 = smov 8  }
  0x34   :  { %31 = dma.hbm_to_vmem [thread:$0]  %s2717_s0, 2048, %s26_s15, [#allocation4], %s2129_s7, %s2129_s7, %s2130_s13  }
  0x35   :  { %s2131_s21 = smov [#allocation8]   ;;  %s2132_s23 = smov [#allocation11]  }
  0x36   :  { %s55_s22 = sshll.u32 %s2131_s21, 4  ;;  %s83_s1 = sshll.u32 %s2132_s23, 4  ;;  %s56_s22 = int_to_ptr.vmem [resolvable:$true] %s55_s22  ;;  %s84_s1 = int_to_ptr.vmem [resolvable:$true] %s83_s1 }
  0x37   :  { %s2050_s25 = scalar_lea.hbm %s2722_s5, 1024 }
  0x38   :  { %p2051_p10 = scmp.ne.s32.totalorder %s2722_s5, %s2050_s25  ;;  %p2054_p11 = scmp.lt.u32.totalorder %s2050_s25, %s2722_s5 }
  0x3a   :  { %p2056_p12 = pnand %p2054_p11, %p2051_p10 }
  0x3c   :  { %2059 = shalt.err (!%p2056_p12)
}
  0x3d   :  { %s2060_s0 = scalar_lea.vmem %s56_s22, 1024  ;;  %p2065_p0 = scmp.lt.s32.totalorder %s56_s22, %s56_s22 }
  0x3e   :  { %p2061_p13 = scmp.ne.s32.totalorder %s56_s22, %s2060_s0  ;;  %p2066_p1 = scmp.lt.s32.totalorder %s2060_s0, %s2060_s0 }
  0x40   :  { %p2067_p2 = por %p2066_p1, %p2065_p0 }
  0x42   :  { %p2068_p3 = pnand %p2067_p2, %p2061_p13 }
  0x44   :  { %2071 = shalt.err (!%p2068_p3)
}
  0x45   :  { %61 = dma.hbm_to_vmem [thread:$0]  %s2722_s5, 1024, %s56_s22, [#allocation7], %s2125_s27, %s2125_s27, %s2126_s28  }
  0x46   :  { %s2072_s19 = scalar_lea.hbm %s2726_s9, 1024 }
  0x47   :  { %p2073_p4 = scmp.ne.s32.totalorder %s2726_s9, %s2072_s19  ;;  %p2076_p5 = scmp.lt.u32.totalorder %s2072_s19, %s2726_s9 }
  0x49   :  { %p2078_p6 = pnand %p2076_p5, %p2073_p4 }
  0x4b   :  { %2081 = shalt.err (!%p2078_p6)
}
  0x4c   :  { %s2082_s24 = scalar_lea.vmem %s84_s1, 1024  ;;  %p2087_p8 = scmp.lt.s32.totalorder %s84_s1, %s84_s1 }
  0x4d   :  { %p2083_p7 = scmp.ne.s32.totalorder %s84_s1, %s2082_s24  ;;  %p2088_p9 = scmp.lt.s32.totalorder %s2082_s24, %s2082_s24 }
  0x4f   :  { %p2089_p10 = por %p2088_p9, %p2087_p8 }
  0x51   :  { %p2090_p11 = pnand %p2089_p10, %p2083_p7 }
  0x53   :  { %2093 = shalt.err (!%p2090_p11)
}
  0x54   :  { %89 = dma.hbm_to_vmem [thread:$0]  %s2726_s9, 1024, %s84_s1, [#allocation10], %s2125_s27, %s2125_s27, %s2126_s28  }
  0x55   :  { %2116 = dma.done.wait [#allocation4], 2048  }
  0x56   :  { %2117 = vsyncadd [#allocation4], 4294965248 }
  0x57   :  { %2118 = dma.done.wait [#allocation7], 3072  }
  0x58   :  { %2119 = vsyncadd [#allocation7], 4294964224 }
  0x59   :  { %2120 = dma.done.wait [#allocation10], 2048  }
  0x5a   :  { %2121 = vsyncadd [#allocation10], 4294965248  ;;  %v1824_v0 = vld [vmem:[#allocation6 + $0x40] sm:$0xff]   ;;  %v1826_v2 = vld [vmem:[#allocation6 + $0x48] sm:$0xff]  }
  0x5b   :  { %v1825_v1 = vld [vmem:[#allocation6] sm:$0xff]   ;;  %1590 = vmatprep.subr.bf16.mxu0 %v1824_v0  ;;  %v1827_v3 = vld [vmem:[#allocation6 + $0x8] sm:$0xff]   ;;  %v1828_v4 = vld [vmem:[#allocation6 + $0x50] sm:$0xff]  }
  0x5c   :  { %1591 = vmatpush3.bf16.msra.mxu0 %v1825_v1  ;;  %v1829_v5 = vld [vmem:[#allocation6 + $0x10] sm:$0xff]   ;;  %v1830_v6 = vld [vmem:[#allocation6 + $0x58] sm:$0xff]   ;;  %v1832_v8 = vld [vmem:[#allocation6 + $0x60] sm:$0xff]  }
  0x5d   :  { %1592 = vmatprep.subr.bf16.mxu0 %v1826_v2  ;;  %v1831_v7 = vld [vmem:[#allocation6 + $0x18] sm:$0xff]   ;;  %v1833_v9 = vld [vmem:[#allocation6 + $0x20] sm:$0xff]   ;;  %v1834_v10 = vld [vmem:[#allocation6 + $0x68] sm:$0xff]  }
  0x5e   :  { %v1842_v11 = vld [vmem:[#allocation3 + $0x4] ss:$8 sps:$4 sm:$0xff]   ;;  %v1836_v13 = vld [vmem:[#allocation6 + $0x70] sm:$0xff]   ;;  %v1838_v15 = vld [vmem:[#allocation6 + $0x78] sm:$0xff]  }
  0x5f   :  { %v1835_v12 = vld [vmem:[#allocation6 + $0x28] sm:$0xff]   ;;  %371 = vmatprep.mubr.bf16.mxu0 %v1842_v11  ;;  %v1837_v14 = vld [vmem:[#allocation6 + $0x30] sm:$0xff]   ;;  %v1839_v16 = vld [vmem:[#allocation6 + $0x38] sm:$0xff]  }
  0x60   :  { %1593 = vmatpush3.bf16.msra.mxu0 %v1827_v3  ;;  %v1840_v17 = vld [vmem:[#allocation3] ss:$8 sps:$4 sm:$0xff]   ;;  %v1843_v18 = vld [vmem:[#allocation3 + $0x14] ss:$8 sps:$4 sm:$0xff]   ;;  %v1845_v19 = vld [vmem:[#allocation3 + $0x10] ss:$8 sps:$4 sm:$0xff]  }
  0x61   :  { %1594 = vmatprep.subr.bf16.mxu0 %v1828_v4  ;;  %v1846_v20 = vld [vmem:[#allocation3 + $0x24] ss:$8 sps:$4 sm:$0xff]   ;;  %v1848_v21 = vld [vmem:[#allocation3 + $0x20] ss:$8 sps:$4 sm:$0xff]   ;;  %v1849_v22 = vld [vmem:[#allocation3 + $0x34] ss:$8 sps:$4 sm:$0xff]  }
  0x62   :  { %v1851_v23 = vld [vmem:[#allocation3 + $0x30] ss:$8 sps:$4 sm:$0xff]   ;;  %v1852_v24 = vld [vmem:[#allocation3 + $0x44] ss:$8 sps:$4 sm:$0xff]   ;;  %v1854_v25 = vld [vmem:[#allocation3 + $0x40] ss:$8 sps:$4 sm:$0xff]  }
  0x63   :  { %v1855_v26 = vld [vmem:[#allocation3 + $0x54] ss:$8 sps:$4 sm:$0xff]   ;;  %v1857_v27 = vld [vmem:[#allocation3 + $0x50] ss:$8 sps:$4 sm:$0xff]   ;;  %v1858_v28 = vld [vmem:[#allocation3 + $0x64] ss:$8 sps:$4 sm:$0xff]  }
  0x64   :  { %1595 = vmatpush3.bf16.msra.mxu0 %v1829_v5  ;;  %v1860_v29 = vld [vmem:[#allocation3 + $0x60] ss:$8 sps:$4 sm:$0xff]   ;;  %v1861_v30 = vld [vmem:[#allocation3 + $0x74] ss:$8 sps:$4 sm:$0xff]   ;;  %v1863_v31 = vld [vmem:[#allocation3 + $0x70] ss:$8 sps:$4 sm:$0xff]  }
  0x65   :  { %1596 = vmatprep.subr.bf16.mxu0 %v1830_v6  ;;  %v2272_v33 = vld [vmem:[%s2719_s2] ss:$0 sm:$0xff] }
  0x68   :  { %1597 = vmatpush3.bf16.msra.mxu0 %v1831_v7 }
  0x69   :  { %1598 = vmatprep.subr.bf16.mxu0 %v1832_v8 }
  0x6c   :  { %1599 = vmatpush3.bf16.msra.mxu0 %v1833_v9 }
  0x6d   :  { %1600 = vmatprep.subr.bf16.mxu0 %v1834_v10 }
  0x70   :  { %1601 = vmatpush3.bf16.msra.mxu0 %v1835_v12 }
  0x71   :  { %1602 = vmatprep.subr.bf16.mxu0 %v1836_v13 }
  0x74   :  { %1603 = vmatpush3.bf16.msra.mxu0 %v1837_v14 }
  0x75   :  { %1604 = vmatprep.subr.bf16.mxu0 %v1838_v15 }
  0x78   :  { %1605 = vmatpush3.bf16.msra.mxu0 %v1839_v16 }
  0x7b   :  { %372 = vmatmul.mubr.bf16.vlgmr.msra.gmra.mrb[0].mxu0 %v1840_v17 }
  0x7c   :  { %379 = vmatprep.mubr.bf16.mxu0 %v1843_v18 }
  0x83   :  { %380 = vmatmul.mubr.bf16.gmra.mrb[4].mxu0 %v1845_v19 }
  0x84   :  { %387 = vmatprep.mubr.bf16.mxu0 %v1846_v20 }
  0x8b   :  { %388 = vmatmul.mubr.bf16.gmra.mrb[8].mxu0 %v1848_v21 }
  0x8c   :  { %395 = vmatprep.mubr.bf16.mxu0 %v1849_v22 }
  0x93   :  { %396 = vmatmul.mubr.bf16.gmra.mrb[12].mxu0 %v1851_v23 }
  0x94   :  { %403 = vmatprep.mubr.bf16.mxu0 %v1852_v24 }
  0x9b   :  { %404 = vmatmul.mubr.bf16.gmra.mrb[16].mxu0 %v1854_v25 }
  0x9c   :  { %411 = vmatprep.mubr.bf16.mxu0 %v1855_v26 }
  0xa3   :  { %412 = vmatmul.mubr.bf16.gmra.mrb[20].mxu0 %v1857_v27 }
  0xa4   :  { %419 = vmatprep.mubr.bf16.mxu0 %v1858_v28 }
  0xab   :  { %420 = vmatmul.mubr.bf16.gmra.mrb[24].mxu0 %v1860_v29 }
  0xac   :  { %427 = vmatprep.mubr.bf16.mxu0 %v1861_v30 }
  0xb3   :  { %428 = vmatmul.mubr.bf16.gmra.mrb[28].mxu0 %v1863_v31 }
 0x14e   :  { %v1606_v32 = vpop.f32.mrb[0].mxu0 }
 0x14f   :  { %v1607_v34 = vpop.f32.mrb[1].mxu0 }
 0x150   :  { %v1608_v35 = vadd.f32 %v1607_v34, %v1606_v32  ;;  %v1609_v36 = vpop.f32.mrb[2].mxu0 }
 0x151   :  { %v1610_v37 = vpop.f32.mrb[3].mxu0 }
 0x152   :  { %v374_v38 = vadd.f32 %v1608_v35, %v2272_v33  ;;  %v1611_v39 = vadd.f32 %v1610_v37, %v1609_v36 }
 0x154   :  { %v2275_v40 = vmax.f32 %v374_v38, 0.0  ;;  %v377_v41 = vadd.f32 %v1611_v39, %v2272_v33 }
 0x156   :  { %v1612_v42 = vpop.f32.mrb[4].mxu0  ;;  %487 = vadd.xlane.f32.xlu0 %v2275_v40  ;;  %v2279_v44 = vmax.f32 %v377_v41, 0.0 }
 0x157   :  { %v1613_v43 = vpop.f32.mrb[5].mxu0 }
 0x158   :  { %v1614_v45 = vadd.f32 %v1613_v43, %v1612_v42  ;;  %v1615_v46 = vpop.f32.mrb[6].mxu0 }
 0x159   :  { %v1616_v47 = vpop.f32.mrb[7].mxu0 }
 0x15a   :  { %v382_v48 = vadd.f32 %v1614_v45, %v2272_v33  ;;  %v1617_v49 = vadd.f32 %v1616_v47, %v1615_v46  ;;  %489 = vadd.xlane.f32.xlu0 %v2279_v44 }
 0x15c   :  { %v2283_v50 = vmax.f32 %v382_v48, 0.0  ;;  %v385_v51 = vadd.f32 %v1617_v49, %v2272_v33 }
 0x15e   :  { %v1618_v52 = vpop.f32.mrb[8].mxu0  ;;  %491 = vadd.xlane.f32.xlu1 %v2283_v50  ;;  %v2287_v54 = vmax.f32 %v385_v51, 0.0 }
 0x15f   :  { %v1619_v53 = vpop.f32.mrb[9].mxu0 }
 0x160   :  { %v1620_v55 = vadd.f32 %v1619_v53, %v1618_v52  ;;  %v1621_v56 = vpop.f32.mrb[10].mxu0  ;;  %v484_v53 = vlaneseq }
 0x161   :  { %v1622_v57 = vpop.f32.mrb[11].mxu0 }
 0x162   :  { %v390_v58 = vadd.f32 %v1620_v55, %v2272_v33  ;;  %v1623_v59 = vadd.f32 %v1622_v57, %v1621_v56  ;;  %493 = vadd.xlane.f32.xlu1 %v2287_v54  ;;  %v2338_v55 = vand.u32 127, %v484_v53 }
 0x164   :  { %v2291_v60 = vmax.f32 %v390_v58, 0.0  ;;  %v393_v61 = vadd.f32 %v1623_v59, %v2272_v33  ;;  %vm486_vm0 = vcmp.lt.s32.totalorder %v2338_v55, 32 }
 0x166   :  { %v2294_v62 = vmax.f32 %v393_v61, 0.0  ;;  %v1624_v63 = vpop.f32.mrb[12].mxu0  ;;  %495 = vadd.xlane.f32.xlu0 %v2291_v60 }
 0x167   :  { %v1625_v0 = vpop.f32.mrb[13].mxu0 }
 0x168   :  { %v1626_v1 = vadd.f32 %v1625_v0, %v1624_v63  ;;  %v1627_v2 = vpop.f32.mrb[14].mxu0  ;;  %497 = vadd.xlane.f32.xlu1 %v2294_v62 }
 0x169   :  { %v1628_v3 = vpop.f32.mrb[15].mxu0 }
 0x16a   :  { %v398_v4 = vadd.f32 %v1626_v1, %v2272_v33  ;;  %v1629_v5 = vadd.f32 %v1628_v3, %v1627_v2 }
 0x16c   :  { %v2299_v6 = vmax.f32 %v398_v4, 0.0  ;;  %v401_v7 = vadd.f32 %v1629_v5, %v2272_v33 }
 0x16e   :  { %v2302_v8 = vmax.f32 %v401_v7, 0.0  ;;  %v1630_v9 = vpop.f32.mrb[16].mxu0  ;;  %499 = vadd.xlane.f32.xlu0 %v2299_v6 }
 0x16f   :  { %v1631_v10 = vpop.f32.mrb[17].mxu0 }
 0x170   :  { %v1632_v11 = vadd.f32 %v1631_v10, %v1630_v9  ;;  %v1633_v12 = vpop.f32.mrb[18].mxu0  ;;  %501 = vadd.xlane.f32.xlu1 %v2302_v8 }
 0x171   :  { %v1634_v13 = vpop.f32.mrb[19].mxu0 }
 0x172   :  { %v406_v14 = vadd.f32 %v1632_v11, %v2272_v33  ;;  %v1635_v15 = vadd.f32 %v1634_v13, %v1633_v12 }
 0x174   :  { %v2307_v16 = vmax.f32 %v406_v14, 0.0  ;;  %v409_v17 = vadd.f32 %v1635_v15, %v2272_v33 }
 0x176   :  { %v2310_v18 = vmax.f32 %v409_v17, 0.0  ;;  %v1636_v19 = vpop.f32.mrb[20].mxu0  ;;  %503 = vadd.xlane.f32.xlu0 %v2307_v16 }
 0x177   :  { %v1637_v20 = vpop.f32.mrb[21].mxu0 }
 0x178   :  { %v1638_v21 = vadd.f32 %v1637_v20, %v1636_v19  ;;  %v1639_v22 = vpop.f32.mrb[22].mxu0  ;;  %505 = vadd.xlane.f32.xlu1 %v2310_v18 }
 0x179   :  { %v1640_v23 = vpop.f32.mrb[23].mxu0 }
 0x17a   :  { %v414_v24 = vadd.f32 %v1638_v21, %v2272_v33  ;;  %v1641_v25 = vadd.f32 %v1640_v23, %v1639_v22 }
 0x17c   :  { %v2315_v26 = vmax.f32 %v414_v24, 0.0  ;;  %v417_v27 = vadd.f32 %v1641_v25, %v2272_v33 }
 0x17e   :  { %v2318_v28 = vmax.f32 %v417_v27, 0.0  ;;  %v1642_v29 = vpop.f32.mrb[24].mxu0  ;;  %507 = vadd.xlane.f32.xlu0 %v2315_v26  ;;  %v1864_v27 = vld [vmem:[#allocation8] sm:$0xff]  }
 0x17f   :  { %v1643_v30 = vpop.f32.mrb[25].mxu0  ;;  %1702 = vmatprep.subr.bf16.mxu1 %v1864_v27 }
 0x180   :  { %v1644_v31 = vadd.f32 %v1643_v30, %v1642_v29  ;;  %v1645_v32 = vpop.f32.mrb[26].mxu0  ;;  %509 = vadd.xlane.f32.xlu1 %v2318_v28  ;;  %1703 = vmatpush3.bf16.msra.mxu1 %v1864_v27 }
 0x181   :  { %v1646_v34 = vpop.f32.mrb[27].mxu0 }
 0x182   :  { %v422_v35 = vadd.f32 %v1644_v31, %v2272_v33  ;;  %v1647_v36 = vadd.f32 %v1646_v34, %v1645_v32 }
 0x184   :  { %v2323_v37 = vmax.f32 %v422_v35, 0.0  ;;  %v425_v38 = vadd.f32 %v1647_v36, %v2272_v33  ;;  %v1865_v36 = vld [vmem:[#allocation8 + $0x8] sm:$0xff]  }
 0x185   :  { %1704 = vmatprep.subr.bf16.mxu1 %v1865_v36 }
 0x186   :  { %v2326_v39 = vmax.f32 %v425_v38, 0.0  ;;  %v1648_v41 = vpop.f32.mrb[28].mxu0  ;;  %511 = vadd.xlane.f32.xlu0 %v2323_v37  ;;  %1705 = vmatpush3.bf16.msra.mxu1 %v1865_v36 }
 0x187   :  { %v1649_v42 = vpop.f32.mrb[29].mxu0 }
 0x188   :  { %v1650_v43 = vadd.f32 %v1649_v42, %v1648_v41  ;;  %v1651_v45 = vpop.f32.mrb[30].mxu0  ;;  %513 = vadd.xlane.f32.xlu1 %v2326_v39 }
 0x189   :  { %v1652_v46 = vpop.f32.mrb[31].mxu0 }
 0x18a   :  { %v430_v47 = vadd.f32 %v1650_v43, %v2272_v33  ;;  %v1653_v48 = vadd.f32 %v1652_v46, %v1651_v45  ;;  %v1866_v45 = vld [vmem:[#allocation8 + $0x10] sm:$0xff]  }
 0x18b   :  { %1706 = vmatprep.subr.bf16.mxu1 %v1866_v45 }
 0x18c   :  { %v2331_v49 = vmax.f32 %v430_v47, 0.0  ;;  %v433_v51 = vadd.f32 %v1653_v48, %v2272_v33  ;;  %1707 = vmatpush3.bf16.msra.mxu1 %v1866_v45 }
 0x18e   :  { %v2334_v52 = vmax.f32 %v433_v51, 0.0  ;;  %515 = vadd.xlane.f32.xlu0 %v2331_v49 }
 0x190   :  { %517 = vadd.xlane.f32.xlu1 %v2334_v52 }
 0x1e3   :  { %v488_v56 = vpop.xlane.xlu0 %487 }
 0x1e4   :  { %v519_v57 = vmul.f32 0.03125, %v488_v56 }
 0x1e6   :  { %v535_v58 = vsub.f32 %v2275_v40, %v519_v57  ;;  %v1867_v57 = vld [vmem:[#allocation8 + $0x18] sm:$0xff]  }
 0x1e7   :  { %v490_v59 = vpop.xlane.xlu0 %489  ;;  %1708 = vmatprep.subr.bf16.mxu1 %v1867_v57 }
 0x1e8   :  { %v520_v61 = vmul.f32 0.03125, %v490_v59  ;;  %v2344_v33 = vsel %vm486_vm0, %v535_v58, 0.0  ;;  %1709 = vmatpush3.bf16.msra.mxu1 %v1867_v57 }
 0x1e9   :  { %v567_v63 = vmul.f32 %v2344_v33, %v2344_v33 }
 0x1ea   :  { %v536_v0 = vsub.f32 %v2279_v44, %v520_v61 }
 0x1eb   :  { %v492_v1 = vpop.xlane.xlu1 %491  ;;  %583 = vadd.xlane.f32.xlu0 %v567_v63 }
 0x1ec   :  { %v521_v2 = vmul.f32 0.03125, %v492_v1  ;;  %v2351_v3 = vsel %vm486_vm0, %v536_v0, 0.0  ;;  %v1868_v0 = vld [vmem:[#allocation8 + $0x20] sm:$0xff]  }
 0x1ed   :  { %v568_v4 = vmul.f32 %v2351_v3, %v2351_v3  ;;  %1710 = vmatprep.subr.bf16.mxu1 %v1868_v0 }
 0x1ee   :  { %v537_v5 = vsub.f32 %v2283_v50, %v521_v2  ;;  %1711 = vmatpush3.bf16.msra.mxu1 %v1868_v0 }
 0x1ef   :  { %v494_v7 = vpop.xlane.xlu1 %493  ;;  %585 = vadd.xlane.f32.xlu1 %v568_v4 }
 0x1f0   :  { %v522_v9 = vmul.f32 0.03125, %v494_v7  ;;  %v2358_v10 = vsel %vm486_vm0, %v537_v5, 0.0 }
 0x1f1   :  { %v569_v11 = vmul.f32 %v2358_v10, %v2358_v10 }
 0x1f2   :  { %v538_v12 = vsub.f32 %v2287_v54, %v522_v9 }
 0x1f3   :  { %587 = vadd.xlane.f32.xlu0 %v569_v11  ;;  %v496_v13 = vpop.xlane.xlu0 %495  ;;  %v1869_v11 = vld [vmem:[#allocation8 + $0x28] sm:$0xff]  }
 0x1f4   :  { %v523_v14 = vmul.f32 0.03125, %v496_v13  ;;  %v2365_v15 = vsel %vm486_vm0, %v538_v12, 0.0  ;;  %1712 = vmatprep.subr.bf16.mxu1 %v1869_v11 }
 0x1f5   :  { %v498_v17 = vpop.xlane.xlu1 %497  ;;  %v570_v19 = vmul.f32 %v2365_v15, %v2365_v15  ;;  %1713 = vmatpush3.bf16.msra.mxu1 %v1869_v11 }
 0x1f6   :  { %v539_v20 = vsub.f32 %v2291_v60, %v523_v14  ;;  %v524_v21 = vmul.f32 0.03125, %v498_v17 }
 0x1f7   :  { %589 = vadd.xlane.f32.xlu1 %v570_v19  ;;  %v1870_v19 = vld [vmem:[#allocation8 + $0x30] sm:$0xff]  }
 0x1f8   :  { %v540_v22 = vsub.f32 %v2294_v62, %v524_v21  ;;  %v2373_v23 = vsel %vm486_vm0, %v539_v20, 0.0  ;;  %1714 = vmatprep.subr.bf16.mxu1 %v1870_v19 }
 0x1f9   :  { %v571_v24 = vmul.f32 %v2373_v23, %v2373_v23  ;;  %1715 = vmatpush3.bf16.msra.mxu1 %v1870_v19 }
 0x1fa   :  { %v2379_v25 = vsel %vm486_vm0, %v540_v22, 0.0 }
 0x1fb   :  { %591 = vadd.xlane.f32.xlu0 %v571_v24  ;;  %v500_v29 = vpop.xlane.xlu0 %499  ;;  %v572_v30 = vmul.f32 %v2379_v25, %v2379_v25 }
 0x1fc   :  { %v525_v31 = vmul.f32 0.03125, %v500_v29 }
 0x1fd   :  { %v502_v32 = vpop.xlane.xlu1 %501  ;;  %593 = vadd.xlane.f32.xlu1 %v572_v30  ;;  %v1871_v30 = vld [vmem:[#allocation8 + $0x38] sm:$0xff]  }
 0x1fe   :  { %v541_v34 = vsub.f32 %v2299_v6, %v525_v31  ;;  %v526_v35 = vmul.f32 0.03125, %v502_v32  ;;  %1716 = vmatprep.subr.bf16.mxu1 %v1871_v30 }
 0x1ff   :  { %1717 = vmatpush3.bf16.msra.mxu1 %v1871_v30 }
 0x200   :  { %v542_v38 = vsub.f32 %v2302_v8, %v526_v35  ;;  %v2387_v41 = vsel %vm486_vm0, %v541_v34, 0.0 }
 0x201   :  { %v573_v42 = vmul.f32 %v2387_v41, %v2387_v41 }
 0x202   :  { %v2393_v43 = vsel %vm486_vm0, %v542_v38, 0.0 }
 0x203   :  { %595 = vadd.xlane.f32.xlu0 %v573_v42  ;;  %v504_v46 = vpop.xlane.xlu0 %503  ;;  %v574_v47 = vmul.f32 %v2393_v43, %v2393_v43 }
 0x204   :  { %v527_v48 = vmul.f32 0.03125, %v504_v46 }
 0x205   :  { %v506_v51 = vpop.xlane.xlu1 %505  ;;  %597 = vadd.xlane.f32.xlu1 %v574_v47 }
 0x206   :  { %v543_v53 = vsub.f32 %v2307_v16, %v527_v48  ;;  %v528_v56 = vmul.f32 0.03125, %v506_v51 }
 0x208   :  { %v544_v58 = vsub.f32 %v2310_v18, %v528_v56  ;;  %v2401_v59 = vsel %vm486_vm0, %v543_v53, 0.0 }
 0x209   :  { %v575_v61 = vmul.f32 %v2401_v59, %v2401_v59 }
 0x20a   :  { %v2407_v63 = vsel %vm486_vm0, %v544_v58, 0.0  ;;  %v2453_v58 = vld [vmem:[#allocation9] sm:$0xff]  }
 0x20b   :  { %599 = vadd.xlane.f32.xlu0 %v575_v61  ;;  %v508_v1 = vpop.xlane.xlu0 %507  ;;  %v576_v2 = vmul.f32 %v2407_v63, %v2407_v63  ;;  %1734 = vmatprep.subr.bf16.mxu1 %v2453_v58 }
 0x20c   :  { %v529_v4 = vmul.f32 0.03125, %v508_v1 }
 0x20d   :  { %v510_v5 = vpop.xlane.xlu1 %509  ;;  %601 = vadd.xlane.f32.xlu1 %v576_v2 }
 0x20e   :  { %v545_v7 = vsub.f32 %v2315_v26, %v529_v4  ;;  %v530_v9 = vmul.f32 0.03125, %v510_v5 }
 0x210   :  { %v546_v12 = vsub.f32 %v2318_v28, %v530_v9  ;;  %v2415_v13 = vsel %vm486_vm0, %v545_v7, 0.0 }
 0x211   :  { %v577_v14 = vmul.f32 %v2415_v13, %v2415_v13 }
 0x212   :  { %v2421_v17 = vsel %vm486_vm0, %v546_v12, 0.0 }
 0x213   :  { %603 = vadd.xlane.f32.xlu0 %v577_v14  ;;  %v512_v20 = vpop.xlane.xlu0 %511  ;;  %v578_v21 = vmul.f32 %v2421_v17, %v2421_v17 }
 0x214   :  { %v531_v22 = vmul.f32 0.03125, %v512_v20 }
 0x215   :  { %v514_v24 = vpop.xlane.xlu1 %513  ;;  %605 = vadd.xlane.f32.xlu1 %v578_v21 }
 0x216   :  { %v547_v27 = vsub.f32 %v2323_v37, %v531_v22  ;;  %v532_v29 = vmul.f32 0.03125, %v514_v24  ;;  %v2460_v24 = vld [vmem:[%s2720_s3] ss:$0 sm:$0xff] }
 0x218   :  { %v548_v31 = vsub.f32 %v2326_v39, %v532_v29  ;;  %v2429_v32 = vsel %vm486_vm0, %v547_v27, 0.0 }
 0x219   :  { %v579_v34 = vmul.f32 %v2429_v32, %v2429_v32 }
 0x21a   :  { %v2435_v35 = vsel %vm486_vm0, %v548_v31, 0.0 }
 0x21b   :  { %607 = vadd.xlane.f32.xlu0 %v579_v34  ;;  %v516_v36 = vpop.xlane.xlu0 %515  ;;  %v580_v38 = vmul.f32 %v2435_v35, %v2435_v35 }
 0x21c   :  { %v533_v42 = vmul.f32 0.03125, %v516_v36 }
 0x21d   :  { %v518_v45 = vpop.xlane.xlu1 %517  ;;  %609 = vadd.xlane.f32.xlu1 %v580_v38 }
 0x21e   :  { %v549_v46 = vsub.f32 %v2331_v49, %v533_v42  ;;  %v534_v47 = vmul.f32 0.03125, %v518_v45 }
 0x220   :  { %v550_v48 = vsub.f32 %v2334_v52, %v534_v47  ;;  %v2443_v51 = vsel %vm486_vm0, %v549_v46, 0.0 }
 0x221   :  { %v581_v53 = vmul.f32 %v2443_v51, %v2443_v51 }
 0x222   :  { %v2449_v56 = vsel %vm486_vm0, %v550_v48, 0.0 }
 0x223   :  { %611 = vadd.xlane.f32.xlu0 %v581_v53  ;;  %v582_v57 = vmul.f32 %v2449_v56, %v2449_v56 }
 0x225   :  { %613 = vadd.xlane.f32.xlu1 %v582_v57 }
 0x278   :  { %v584_v61 = vpop.xlane.xlu0 %583 }
 0x279   :  { %v615_v0 = vmul.f32 0.03125, %v584_v61 }
 0x27b   :  { %v631_v1 = vadd.f32 1e-05, %v615_v0 }
 0x27c   :  { %v586_v2 = vpop.xlane.xlu1 %585 }
 0x27d   :  { %1888 = vrsqrt.f32 %v631_v1  ;;  %v616_v4 = vmul.f32 0.03125, %v586_v2 }
 0x27f   :  { %v632_v5 = vadd.f32 1e-05, %v616_v4 }
 0x280   :  { %v588_v7 = vpop.xlane.xlu0 %587 }
 0x281   :  { %1890 = vrsqrt.f32 %v632_v5  ;;  %v617_v55 = vmul.f32 0.03125, %v588_v7 }
 0x283   :  { %v633_v9 = vadd.f32 1e-05, %v617_v55 }
 0x284   :  { %v590_v11 = vpop.xlane.xlu1 %589 }
 0x285   :  { %1892 = vrsqrt.f32 %v633_v9  ;;  %v618_v12 = vmul.f32 0.03125, %v590_v11 }
 0x287   :  { %v1889_v14 = vpop.eup %1888  ;;  %v634_v19 = vadd.f32 1e-05, %v618_v12 }
 0x288   :  { %v592_v20 = vpop.xlane.xlu0 %591  ;;  %v663_v21 = vmul.f32 %v1889_v14, %v2344_v33  ;;  %v2467_v33 = vld [vmem:[%s2721_s4] ss:$0 sm:$0xff] }
 0x289   :  { %1894 = vrsqrt.f32 %v634_v19  ;;  %v619_v22 = vmul.f32 0.03125, %v592_v20 }
 0x28a   :  { %v594_v27 = vpop.xlane.xlu1 %593  ;;  %v686_v36 = vmul.f32 %v2460_v24, %v663_v21 }
 0x28b   :  { %v1891_v29 = vpop.eup %1890  ;;  %v635_v30 = vadd.f32 1e-05, %v619_v22  ;;  %v620_v31 = vmul.f32 0.03125, %v594_v27 }
 0x28c   :  { %v664_v34 = vmul.f32 %v1891_v29, %v2351_v3  ;;  %v709_v47 = vadd.f32 %v2467_v33, %v686_v36  ;;  %v1873_v29 = vld [vmem:[#allocation9 + $0x8] sm:$0xff]  }
 0x28d   :  { %1896 = vrsqrt.f32 %v635_v30  ;;  %v636_v38 = vadd.f32 1e-05, %v620_v31 }
 0x28e   :  { %v687_v42 = vmul.f32 %v2460_v24, %v664_v34 }
 0x28f   :  { %v1893_v45 = vpop.eup %1892  ;;  %1898 = vrsqrt.f32 %v636_v38 }
 0x290   :  { %v596_v46 = vpop.xlane.xlu0 %595  ;;  %v710_v48 = vadd.f32 %v2467_v33, %v687_v42  ;;  %v665_v3 = vmul.f32 %v1893_v45, %v2358_v10  ;;  %v1874_v42 = vld [vmem:[#allocation9 + $0x10] sm:$0xff]  }
 0x291   :  { %v621_v53 = vmul.f32 0.03125, %v596_v46 }
 0x292   :  { %v598_v57 = vpop.xlane.xlu1 %597  ;;  %v725_v61 = vpack.c.bf16 %v710_v48, %v709_v47  ;;  %v688_v5 = vmul.f32 %v2460_v24, %v665_v3 }
 0x293   :  { %v1895_v0 = vpop.eup %1894  ;;  %v637_v1 = vadd.f32 1e-05, %v621_v53  ;;  %v622_v2 = vmul.f32 0.03125, %v598_v57 }
 0x294   :  { %1718 = vmatprep.mubr.bf16.mxu1 %v725_v61  ;;  %v666_v4 = vmul.f32 %v1895_v0, %v2365_v15  ;;  %v711_v10 = vadd.f32 %v2467_v33, %v688_v5  ;;  %v1875_v61 = vld [vmem:[#allocation9 + $0x18] sm:$0xff]  }
 0x295   :  { %1900 = vrsqrt.f32 %v637_v1  ;;  %v638_v7 = vadd.f32 1e-05, %v622_v2 }
 0x296   :  { %v689_v55 = vmul.f32 %v2460_v24, %v666_v4 }
 0x297   :  { %v1897_v9 = vpop.eup %1896  ;;  %1902 = vrsqrt.f32 %v638_v7  ;;  %v1876_v7 = vld [vmem:[#allocation9 + $0x20] sm:$0xff]  }
 0x298   :  { %v600_v11 = vpop.xlane.xlu0 %599  ;;  %v712_v12 = vadd.f32 %v2467_v33, %v689_v55  ;;  %v667_v14 = vmul.f32 %v1897_v9, %v2373_v23 }
 0x299   :  { %v1899_v19 = vpop.eup %1898  ;;  %v623_v20 = vmul.f32 0.03125, %v600_v11 }
 0x29a   :  { %v602_v21 = vpop.xlane.xlu1 %601  ;;  %v726_v22 = vpack.c.bf16 %v712_v12, %v711_v10  ;;  %v668_v15 = vmul.f32 %v1899_v19, %v2379_v25  ;;  %v690_v27 = vmul.f32 %v2460_v24, %v667_v14 }
 0x29b   :  { %v639_v30 = vadd.f32 1e-05, %v623_v20  ;;  %v624_v31 = vmul.f32 0.03125, %v602_v21  ;;  %v1877_v21 = vld [vmem:[#allocation9 + $0x28] sm:$0xff]  }
 0x29c   :  { %1719 = vmatmul.mubr.bf16.vlgmr.msra.gmra.mrb[0].mxu1 %v726_v22  ;;  %v691_v34 = vmul.f32 %v2460_v24, %v668_v15  ;;  %v713_v23 = vadd.f32 %v2467_v33, %v690_v27 }
 0x29d   :  { %1904 = vrsqrt.f32 %v639_v30  ;;  %v640_v36 = vadd.f32 1e-05, %v624_v31  ;;  %1735 = vmatpush3.bf16.msra.mxu1 %v2453_v58 }
 0x29e   :  { %v714_v38 = vadd.f32 %v2467_v33, %v691_v34  ;;  %1736 = vmatprep.subr.bf16.mxu1 %v1873_v29 }
 0x29f   :  { %v1901_v45 = vpop.eup %1900  ;;  %1906 = vrsqrt.f32 %v640_v36 }
 0x2a0   :  { %v604_v25 = vpop.xlane.xlu0 %603  ;;  %v727_v46 = vpack.c.bf16 %v714_v38, %v713_v23  ;;  %v669_v47 = vmul.f32 %v1901_v45, %v2387_v41 }
 0x2a1   :  { %v1903_v48 = vpop.eup %1902  ;;  %v625_v3 = vmul.f32 0.03125, %v604_v25  ;;  %1737 = vmatpush3.bf16.msra.mxu1 %v1873_v29 }
 0x2a2   :  { %v606_v53 = vpop.xlane.xlu1 %605  ;;  %1722 = vmatprep.mubr.bf16.mxu1 %v727_v46  ;;  %v670_v57 = vmul.f32 %v1903_v48, %v2393_v43  ;;  %v692_v58 = vmul.f32 %v2460_v24, %v669_v47  ;;  %1738 = vmatprep.subr.bf16.mxu1 %v1874_v42 }
 0x2a3   :  { %v641_v0 = vadd.f32 1e-05, %v625_v3  ;;  %v626_v1 = vmul.f32 0.03125, %v606_v53 }
 0x2a4   :  { %v693_v2 = vmul.f32 %v2460_v24, %v670_v57  ;;  %v715_v41 = vadd.f32 %v2467_v33, %v692_v58 }
 0x2a5   :  { %1908 = vrsqrt.f32 %v641_v0  ;;  %v642_v4 = vadd.f32 1e-05, %v626_v1  ;;  %1739 = vmatpush3.bf16.msra.mxu1 %v1874_v42 }
 0x2a6   :  { %v716_v5 = vadd.f32 %v2467_v33, %v693_v2  ;;  %1740 = vmatprep.subr.bf16.mxu1 %v1875_v61 }
 0x2a7   :  { %v1905_v55 = vpop.eup %1904  ;;  %1910 = vrsqrt.f32 %v642_v4 }
 0x2a8   :  { %v608_v43 = vpop.xlane.xlu0 %607  ;;  %v728_v9 = vpack.c.bf16 %v716_v5, %v715_v41  ;;  %v671_v11 = vmul.f32 %v1905_v55, %v2401_v59 }
 0x2a9   :  { %v1907_v10 = vpop.eup %1906  ;;  %v627_v12 = vmul.f32 0.03125, %v608_v43  ;;  %1741 = vmatpush3.bf16.msra.mxu1 %v1875_v61 }
 0x2aa   :  { %v610_v14 = vpop.xlane.xlu1 %609  ;;  %1723 = vmatmul.mubr.bf16.gmra.mrb[4].mxu1 %v728_v9  ;;  %v672_v19 = vmul.f32 %v1907_v10, %v2407_v63  ;;  %v694_v20 = vmul.f32 %v2460_v24, %v671_v11  ;;  %1742 = vmatprep.subr.bf16.mxu1 %v1876_v7 }
 0x2ab   :  { %v643_v22 = vadd.f32 1e-05, %v627_v12  ;;  %v628_v15 = vmul.f32 0.03125, %v610_v14  ;;  %v1878_v14 = vld [vmem:[#allocation9 + $0x30] sm:$0xff]  }
 0x2ac   :  { %v695_v27 = vmul.f32 %v2460_v24, %v672_v19  ;;  %v717_v59 = vadd.f32 %v2467_v33, %v694_v20  ;;  %v1879_v19 = vld [vmem:[#allocation9 + $0x38] sm:$0xff]   ;;  %v1881_v20 = vld [vmem:[#allocation11 + $0x8] sm:$0xff]  }
 0x2ad   :  { %1912 = vrsqrt.f32 %v643_v22  ;;  %v644_v29 = vadd.f32 1e-05, %v628_v15  ;;  %1743 = vmatpush3.bf16.msra.mxu1 %v1876_v7  ;;  %v2518_v22 = vld [vmem:[%s2723_s6] ss:$0 sm:$0xff] }
 0x2ae   :  { %v718_v30 = vadd.f32 %v2467_v33, %v695_v27  ;;  %1744 = vmatprep.subr.bf16.mxu1 %v1877_v21 }
 0x2af   :  { %v1909_v31 = vpop.eup %1908  ;;  %1914 = vrsqrt.f32 %v644_v29 }
 0x2b0   :  { %v612_v34 = vpop.xlane.xlu0 %611  ;;  %v729_v63 = vpack.c.bf16 %v718_v30, %v717_v59  ;;  %v673_v36 = vmul.f32 %v1909_v31, %v2415_v13 }
 0x2b1   :  { %v1911_v23 = vpop.eup %1910  ;;  %v629_v38 = vmul.f32 0.03125, %v612_v34  ;;  %1745 = vmatpush3.bf16.msra.mxu1 %v1877_v21  ;;  %v1885_v21 = vld [vmem:[#allocation11 + $0x28] sm:$0xff]  }
 0x2b2   :  { %v614_v42 = vpop.xlane.xlu1 %613  ;;  %1726 = vmatprep.mubr.bf16.mxu1 %v729_v63  ;;  %v674_v45 = vmul.f32 %v1911_v23, %v2421_v17  ;;  %v696_v25 = vmul.f32 %v2460_v24, %v673_v36  ;;  %1746 = vmatprep.subr.bf16.mxu1 %v1878_v14 }
 0x2b3   :  { %v645_v46 = vadd.f32 1e-05, %v629_v38  ;;  %v630_v47 = vmul.f32 0.03125, %v614_v42 }
 0x2b4   :  { %v697_v48 = vmul.f32 %v2460_v24, %v674_v45  ;;  %v719_v53 = vadd.f32 %v2467_v33, %v696_v25 }
 0x2b5   :  { %1916 = vrsqrt.f32 %v645_v46  ;;  %v646_v3 = vadd.f32 1e-05, %v630_v47  ;;  %1747 = vmatpush3.bf16.msra.mxu1 %v1878_v14 }
 0x2b6   :  { %v720_v57 = vadd.f32 %v2467_v33, %v697_v48  ;;  %1748 = vmatprep.subr.bf16.mxu1 %v1879_v19 }
 0x2b7   :  { %v1913_v13 = vpop.eup %1912  ;;  %1918 = vrsqrt.f32 %v646_v3 }
 0x2b8   :  { %v730_v58 = vpack.c.bf16 %v720_v57, %v719_v53  ;;  %v675_v61 = vmul.f32 %v1913_v13, %v2429_v32 }
 0x2b9   :  { %v1915_v0 = vpop.eup %1914  ;;  %1749 = vmatpush3.bf16.msra.mxu1 %v1879_v19 }
 0x2ba   :  { %1727 = vmatmul.mubr.bf16.gmra.mrb[8].mxu1 %v730_v58  ;;  %v676_v17 = vmul.f32 %v1915_v0, %v2435_v35  ;;  %v698_v1 = vmul.f32 %v2460_v24, %v675_v61 }
 0x2bc   :  { %v699_v2 = vmul.f32 %v2460_v24, %v676_v17  ;;  %v721_v4 = vadd.f32 %v2467_v33, %v698_v1 }
 0x2be   :  { %v722_v41 = vadd.f32 %v2467_v33, %v699_v2 }
 0x2bf   :  { %v1917_v5 = vpop.eup %1916 }
 0x2c0   :  { %v731_v7 = vpack.c.bf16 %v722_v41, %v721_v4  ;;  %v677_v55 = vmul.f32 %v1917_v5, %v2443_v51  ;;  %v1880_v51 = vld [vmem:[#allocation11] sm:$0xff]  }
 0x2c1   :  { %v1919_v43 = vpop.eup %1918  ;;  %1766 = vmatprep.subr.bf16.mxu0 %v1880_v51  ;;  %1798 = vmatprep.subr.bf16.mxu1 %v1880_v51 }
 0x2c2   :  { %1730 = vmatprep.mubr.bf16.mxu1 %v731_v7  ;;  %v678_v32 = vmul.f32 %v1919_v43, %v2449_v56  ;;  %v700_v9 = vmul.f32 %v2460_v24, %v677_v55  ;;  %1767 = vmatpush3.bf16.msra.mxu0 %v1880_v51  ;;  %v1882_v56 = vld [vmem:[#allocation11 + $0x10] sm:$0xff]  }
 0x2c3   :  { %1768 = vmatprep.subr.bf16.mxu0 %v1881_v20 }
 0x2c4   :  { %v701_v35 = vmul.f32 %v2460_v24, %v678_v32  ;;  %v723_v11 = vadd.f32 %v2467_v33, %v700_v9  ;;  %v1883_v24 = vld [vmem:[#allocation11 + $0x18] sm:$0xff]  }
 0x2c6   :  { %v724_v10 = vadd.f32 %v2467_v33, %v701_v35  ;;  %1769 = vmatpush3.bf16.msra.mxu0 %v1881_v20  ;;  %v1884_v33 = vld [vmem:[#allocation11 + $0x20] sm:$0xff]  }
 0x2c7   :  { %1770 = vmatprep.subr.bf16.mxu0 %v1882_v56 }
 0x2c8   :  { %v732_v12 = vpack.c.bf16 %v724_v10, %v723_v11 }
 0x2ca   :  { %1731 = vmatmul.mubr.bf16.gmra.mrb[12].mxu1 %v732_v12  ;;  %1771 = vmatpush3.bf16.msra.mxu0 %v1882_v56 }
 0x2cb   :  { %1772 = vmatprep.subr.bf16.mxu0 %v1883_v24 }
 0x2ce   :  { %1773 = vmatpush3.bf16.msra.mxu0 %v1883_v24 }
 0x2cf   :  { %1774 = vmatprep.subr.bf16.mxu0 %v1884_v33 }
 0x2d2   :  { %1775 = vmatpush3.bf16.msra.mxu0 %v1884_v33 }
 0x2d3   :  { %1776 = vmatprep.subr.bf16.mxu0 %v1885_v21 }
 0x2d6   :  { %1777 = vmatpush3.bf16.msra.mxu0 %v1885_v21 }
 0x36f   :  { %v1720_v15 = vpop.f32.mrb[0].mxu1 }
 0x370   :  { %v847_v27 = vadd.f32 %v1720_v15, %v2518_v22  ;;  %v838_v29 = vpop.f32.mrb[1].mxu1 }
 0x371   :  { %v839_v59 = vadd.f32 %v2518_v22, %v838_v29  ;;  %v1721_v30 = vpop.f32.mrb[2].mxu1 }
 0x372   :  { %v850_v31 = vadd.f32 %v1721_v30, %v2518_v22  ;;  %v841_v34 = vpop.f32.mrb[3].mxu1  ;;  %v903_v36 = vmax.f32 %v847_v27, 0.0 }
 0x373   :  { %v842_v63 = vadd.f32 %v2518_v22, %v841_v34  ;;  %v901_v38 = vmax.f32 %v839_v59, 0.0 }
 0x374   :  { %v904_v23 = vmax.f32 %v850_v31, 0.0 }
 0x375   :  { %v902_v42 = vmax.f32 %v842_v63, 0.0 }
 0x376   :  { %v918_v45 = vpack.c.bf16 %v904_v23, %v903_v36  ;;  %v1886_v23 = vld [vmem:[#allocation11 + $0x30] sm:$0xff]  }
 0x377   :  { %v917_v25 = vpack.c.bf16 %v902_v42, %v901_v38  ;;  %1778 = vmatprep.subr.bf16.mxu0 %v1886_v23  ;;  %v1887_v38 = vld [vmem:[#allocation11 + $0x38] sm:$0xff]  }
 0x378   :  { %1779 = vmatpush3.bf16.msra.mxu0 %v1886_v23 }
 0x379   :  { %1750 = vmatprep.mubr.bf16.mxu1 %v917_v25  ;;  %1780 = vmatprep.subr.bf16.mxu0 %v1887_v38 }
 0x37a   :  { %1751 = vmatmul.mubr.bf16.vlgmr.msra.gmra.mrb[16].mxu1 %v918_v45 }
 0x37b   :  { %1806 = vmatpush3.bf16.msra.mxu1 %v1880_v51 }
 0x37c   :  { %1799 = vmatprep.subr.bf16.mxu1 %v1881_v20  ;;  %1781 = vmatpush3.bf16.msra.mxu0 %v1887_v38 }
 0x37d   :  { %v1724_v46 = vpop.f32.mrb[4].mxu1 }
 0x37e   :  { %v863_v47 = vadd.f32 %v1724_v46, %v2518_v22  ;;  %v854_v48 = vpop.f32.mrb[5].mxu1 }
 0x37f   :  { %v855_v3 = vadd.f32 %v2518_v22, %v854_v48  ;;  %v1725_v53 = vpop.f32.mrb[6].mxu1  ;;  %1807 = vmatpush3.bf16.msra.mxu1 %v1881_v20 }
 0x380   :  { %v866_v57 = vadd.f32 %v1725_v53, %v2518_v22  ;;  %v857_v13 = vpop.f32.mrb[7].mxu1  ;;  %1800 = vmatprep.subr.bf16.mxu1 %v1882_v56  ;;  %v907_v61 = vmax.f32 %v863_v47, 0.0 }
 0x381   :  { %v858_v58 = vadd.f32 %v2518_v22, %v857_v13  ;;  %v905_v17 = vmax.f32 %v855_v3, 0.0 }
 0x382   :  { %v908_v0 = vmax.f32 %v866_v57, 0.0 }
 0x383   :  { %v906_v1 = vmax.f32 %v858_v58, 0.0  ;;  %1808 = vmatpush3.bf16.msra.mxu1 %v1882_v56 }
 0x384   :  { %v920_v2 = vpack.c.bf16 %v908_v0, %v907_v61  ;;  %1801 = vmatprep.subr.bf16.mxu1 %v1883_v24 }
 0x385   :  { %v919_v4 = vpack.c.bf16 %v906_v1, %v905_v17 }
 0x387   :  { %1754 = vmatprep.mubr.bf16.mxu1 %v919_v4  ;;  %1809 = vmatpush3.bf16.msra.mxu1 %v1883_v24 }
 0x388   :  { %1755 = vmatmul.mubr.bf16.gmra.mrb[20].mxu1 %v920_v2  ;;  %1802 = vmatprep.subr.bf16.mxu1 %v1884_v33 }
 0x38b   :  { %1810 = vmatpush3.bf16.msra.mxu1 %v1884_v33 }
 0x38c   :  { %1803 = vmatprep.subr.bf16.mxu1 %v1885_v21 }
 0x38d   :  { %v1728_v41 = vpop.f32.mrb[8].mxu1 }
 0x38e   :  { %v879_v5 = vadd.f32 %v1728_v41, %v2518_v22  ;;  %v870_v7 = vpop.f32.mrb[9].mxu1 }
 0x38f   :  { %v871_v55 = vadd.f32 %v2518_v22, %v870_v7  ;;  %v1729_v43 = vpop.f32.mrb[10].mxu1  ;;  %1811 = vmatpush3.bf16.msra.mxu1 %v1885_v21 }
 0x390   :  { %v882_v32 = vadd.f32 %v1729_v43, %v2518_v22  ;;  %v873_v9 = vpop.f32.mrb[11].mxu1  ;;  %v911_v11 = vmax.f32 %v879_v5, 0.0  ;;  %1804 = vmatprep.subr.bf16.mxu1 %v1886_v23 }
 0x391   :  { %v874_v35 = vadd.f32 %v2518_v22, %v873_v9  ;;  %v909_v12 = vmax.f32 %v871_v55, 0.0 }
 0x392   :  { %v912_v10 = vmax.f32 %v882_v32, 0.0 }
 0x393   :  { %v910_v14 = vmax.f32 %v874_v35, 0.0  ;;  %1812 = vmatpush3.bf16.msra.mxu1 %v1886_v23 }
 0x394   :  { %v922_v19 = vpack.c.bf16 %v912_v10, %v911_v11  ;;  %1805 = vmatprep.subr.bf16.mxu1 %v1887_v38 }
 0x395   :  { %v921_v51 = vpack.c.bf16 %v910_v14, %v909_v12 }
 0x397   :  { %1758 = vmatprep.mubr.bf16.mxu1 %v921_v51  ;;  %1813 = vmatpush3.bf16.msra.mxu1 %v1887_v38 }
 0x398   :  { %1759 = vmatmul.mubr.bf16.gmra.mrb[24].mxu1 %v922_v19 }
 0x39d   :  { %v1732_v20 = vpop.f32.mrb[12].mxu1 }
 0x39e   :  { %v895_v56 = vadd.f32 %v1732_v20, %v2518_v22  ;;  %v886_v24 = vpop.f32.mrb[13].mxu1 }
 0x39f   :  { %v887_v33 = vadd.f32 %v2518_v22, %v886_v24  ;;  %v1733_v21 = vpop.f32.mrb[14].mxu1 }
 0x3a0   :  { %v898_v15 = vadd.f32 %v1733_v21, %v2518_v22  ;;  %v889_v27 = vpop.f32.mrb[15].mxu1  ;;  %v915_v59 = vmax.f32 %v895_v56, 0.0 }
 0x3a1   :  { %v890_v29 = vadd.f32 %v2518_v22, %v889_v27  ;;  %v913_v31 = vmax.f32 %v887_v33, 0.0  ;;  %v1572_v22 = vld [vmem:[%s2725_s8] ss:$0 sm:$0xff] }
 0x3a2   :  { %v916_v30 = vmax.f32 %v898_v15, 0.0 }
 0x3a3   :  { %v914_v34 = vmax.f32 %v890_v29, 0.0 }
 0x3a4   :  { %v924_v63 = vpack.c.bf16 %v916_v30, %v915_v59 }
 0x3a5   :  { %v923_v36 = vpack.c.bf16 %v914_v34, %v913_v31 }
 0x3a7   :  { %1762 = vmatprep.mubr.bf16.mxu1 %v923_v36  ;;  %v1581_v36 = vld [vmem:[%s2727_s10] ss:$0 sm:$0xff]  ;;  %s2133_s10 = smov [#allocation12]  }
 0x3a8   :  { %1763 = vmatmul.mubr.bf16.gmra.mrb[28].mxu1 %v924_v63  ;;  %s1514_s30 = sshll.u32 %s2133_s10, 4  ;;  %s1515_s30 = int_to_ptr.vmem [resolvable:$true] %s1514_s30 }
 0x3a9   :  { %s2094_s12 = scalar_lea.vmem %s1515_s30, 2048  ;;  %p2099_p13 = scmp.lt.s32.totalorder %s1515_s30, %s1515_s30 }
 0x3aa   :  { %p2095_p12 = scmp.ne.s32.totalorder %s1515_s30, %s2094_s12  ;;  %p2100_p0 = scmp.lt.s32.totalorder %s2094_s12, %s2094_s12 }
 0x3ac   :  { %p2101_p1 = por %p2100_p0, %p2099_p13 }
 0x3ae   :  { %p2102_p2 = pnand %p2101_p1, %p2095_p12 }
 0x44d   :  { %v1752_v42 = vpop.f32.mrb[16].mxu1 }
 0x44e   :  { %v1039_v45 = vadd.f32 %v1752_v42, %v1572_v22  ;;  %v1030_v25 = vpop.f32.mrb[17].mxu1 }
 0x44f   :  { %v1031_v46 = vadd.f32 %v1572_v22, %v1030_v25  ;;  %v1753_v47 = vpop.f32.mrb[18].mxu1 }
 0x450   :  { %v1042_v48 = vadd.f32 %v1753_v47, %v1572_v22  ;;  %v1033_v3 = vpop.f32.mrb[19].mxu1  ;;  %v1095_v57 = vadd.f32 %v1039_v45, %v2283_v50 }
 0x451   :  { %v1034_v53 = vadd.f32 %v1572_v22, %v1033_v3  ;;  %v1093_v58 = vadd.f32 %v1031_v46, %v2275_v40 }
 0x452   :  { %v1096_v13 = vadd.f32 %v1042_v48, %v2287_v54 }
 0x453   :  { %v1094_v61 = vadd.f32 %v1034_v53, %v2279_v44 }
 0x454   :  { %v1142_v0 = vpack.c.bf16 %v1096_v13, %v1095_v57 }
 0x455   :  { %v1141_v17 = vpack.c.bf16 %v1094_v61, %v1093_v58 }
 0x457   :  { %1782 = vmatprep.mubr.bf16.mxu0 %v1141_v17 }
 0x458   :  { %1783 = vmatmul.mubr.bf16.vlgmr.msra.gmra.mrb[32].mxu0 %v1142_v0 }
 0x45b   :  { %v1756_v1 = vpop.f32.mrb[20].mxu1 }
 0x45c   :  { %v1055_v2 = vadd.f32 %v1756_v1, %v1572_v22  ;;  %v1046_v4 = vpop.f32.mrb[21].mxu1 }
 0x45d   :  { %v1047_v41 = vadd.f32 %v1572_v22, %v1046_v4  ;;  %v1757_v5 = vpop.f32.mrb[22].mxu1 }
 0x45e   :  { %v1058_v7 = vadd.f32 %v1757_v5, %v1572_v22  ;;  %v1049_v55 = vpop.f32.mrb[23].mxu1  ;;  %v1099_v50 = vadd.f32 %v1055_v2, %v2299_v6 }
 0x45f   :  { %v1050_v43 = vadd.f32 %v1572_v22, %v1049_v55  ;;  %v1097_v40 = vadd.f32 %v1047_v41, %v2291_v60 }
 0x460   :  { %v1100_v54 = vadd.f32 %v1058_v7, %v2302_v8 }
 0x461   :  { %v1098_v44 = vadd.f32 %v1050_v43, %v2294_v62 }
 0x462   :  { %v1144_v32 = vpack.c.bf16 %v1100_v54, %v1099_v50 }
 0x463   :  { %v1143_v9 = vpack.c.bf16 %v1098_v44, %v1097_v40 }
 0x465   :  { %1786 = vmatprep.mubr.bf16.mxu0 %v1143_v9 }
 0x466   :  { %1787 = vmatmul.mubr.bf16.gmra.mrb[36].mxu0 %v1144_v32 }
 0x46b   :  { %v1760_v35 = vpop.f32.mrb[24].mxu1 }
 0x46c   :  { %v1071_v11 = vadd.f32 %v1760_v35, %v1572_v22  ;;  %v1062_v10 = vpop.f32.mrb[25].mxu1 }
 0x46d   :  { %v1063_v12 = vadd.f32 %v1572_v22, %v1062_v10  ;;  %v1761_v14 = vpop.f32.mrb[26].mxu1 }
 0x46e   :  { %v1074_v19 = vadd.f32 %v1761_v14, %v1572_v22  ;;  %v1065_v51 = vpop.f32.mrb[27].mxu1  ;;  %v1103_v6 = vadd.f32 %v1071_v11, %v2315_v26 }
 0x46f   :  { %v1066_v20 = vadd.f32 %v1572_v22, %v1065_v51  ;;  %v1101_v60 = vadd.f32 %v1063_v12, %v2307_v16 }
 0x470   :  { %v1104_v8 = vadd.f32 %v1074_v19, %v2318_v28 }
 0x471   :  { %v1102_v62 = vadd.f32 %v1066_v20, %v2310_v18 }
 0x472   :  { %v1146_v56 = vpack.c.bf16 %v1104_v8, %v1103_v6 }
 0x473   :  { %v1145_v24 = vpack.c.bf16 %v1102_v62, %v1101_v60 }
 0x475   :  { %1790 = vmatprep.mubr.bf16.mxu1 %v1145_v24 }
 0x476   :  { %1791 = vmatmul.mubr.bf16.vlgmr.msra.gmra.mrb[32].mxu1 %v1146_v56 }
 0x47b   :  { %v1764_v33 = vpop.f32.mrb[28].mxu1 }
 0x47c   :  { %v1087_v21 = vadd.f32 %v1764_v33, %v1572_v22  ;;  %v1078_v15 = vpop.f32.mrb[29].mxu1 }
 0x47d   :  { %v1079_v27 = vadd.f32 %v1572_v22, %v1078_v15  ;;  %v1765_v29 = vpop.f32.mrb[30].mxu1 }
 0x47e   :  { %v1090_v59 = vadd.f32 %v1765_v29, %v1572_v22  ;;  %v1081_v30 = vpop.f32.mrb[31].mxu1  ;;  %v1107_v26 = vadd.f32 %v1087_v21, %v2331_v49 }
 0x47f   :  { %v1082_v31 = vadd.f32 %v1572_v22, %v1081_v30  ;;  %v1105_v16 = vadd.f32 %v1079_v27, %v2323_v37 }
 0x480   :  { %v1108_v28 = vadd.f32 %v1090_v59, %v2334_v52 }
 0x481   :  { %v1106_v18 = vadd.f32 %v1082_v31, %v2326_v39 }
 0x482   :  { %v1148_v34 = vpack.c.bf16 %v1108_v28, %v1107_v26 }
 0x483   :  { %v1147_v63 = vpack.c.bf16 %v1106_v18, %v1105_v16 }
 0x485   :  { %1794 = vmatprep.mubr.bf16.mxu1 %v1147_v63 }
 0x486   :  { %1795 = vmatmul.mubr.bf16.gmra.mrb[36].mxu1 %v1148_v34 }
 0x52b   :  { %v1784_v23 = vpop.f32.mrb[32].mxu0 }
 0x52c   :  { %v2558_v38 = vadd.f32 %v1784_v23, %v1581_v36  ;;  %v1254_v22 = vpop.f32.mrb[33].mxu0 }
 0x52d   :  { %v1785_v42 = vpop.f32.mrb[34].mxu0  ;;  %v2563_v52 = vadd.f32 %v1581_v36, %v1254_v22 }
 0x52e   :  { %v2560_v49 = vadd.f32 %v1785_v42, %v1581_v36  ;;  %1321 = vmax.xlane.f32.xlu0 %v2558_v38  ;;  %v1257_v37 = vpop.f32.mrb[35].mxu0 }
 0x52f   :  { %v2566_v39 = vadd.f32 %v1581_v36, %v1257_v37 }
 0x530   :  { %1323 = vmax.xlane.f32.xlu1 %v2560_v49 }
 0x532   :  { %1317 = vmax.xlane.f32.xlu0 %v2563_v52 }
 0x534   :  { %1319 = vmax.xlane.f32.xlu1 %v2566_v39 }
 0x539   :  { %v1788_v45 = vpop.f32.mrb[36].mxu0 }
 0x53a   :  { %v2570_v25 = vadd.f32 %v1788_v45, %v1581_v36  ;;  %v1270_v46 = vpop.f32.mrb[37].mxu0 }
 0x53b   :  { %v1789_v47 = vpop.f32.mrb[38].mxu0  ;;  %v2575_v53 = vadd.f32 %v1581_v36, %v1270_v46 }
 0x53c   :  { %v2572_v48 = vadd.f32 %v1789_v47, %v1581_v36  ;;  %v1273_v3 = vpop.f32.mrb[39].mxu0  ;;  %1329 = vmax.xlane.f32.xlu0 %v2570_v25 }
 0x53d   :  { %v2578_v57 = vadd.f32 %v1581_v36, %v1273_v3 }
 0x53e   :  { %1331 = vmax.xlane.f32.xlu1 %v2572_v48 }
 0x540   :  { %1325 = vmax.xlane.f32.xlu0 %v2575_v53 }
 0x542   :  { %1327 = vmax.xlane.f32.xlu1 %v2578_v57 }
 0x549   :  { %v1792_v13 = vpop.f32.mrb[32].mxu1 }
 0x54a   :  { %v2582_v58 = vadd.f32 %v1792_v13, %v1581_v36  ;;  %v1286_v61 = vpop.f32.mrb[33].mxu1 }
 0x54b   :  { %v1793_v0 = vpop.f32.mrb[34].mxu1  ;;  %v2587_v2 = vadd.f32 %v1581_v36, %v1286_v61 }
 0x54c   :  { %v2584_v17 = vadd.f32 %v1793_v0, %v1581_v36  ;;  %1337 = vmax.xlane.f32.xlu0 %v2582_v58  ;;  %v1289_v1 = vpop.f32.mrb[35].mxu1 }
 0x54d   :  { %v2590_v4 = vadd.f32 %v1581_v36, %v1289_v1 }
 0x54e   :  { %1339 = vmax.xlane.f32.xlu1 %v2584_v17 }
 0x550   :  { %1333 = vmax.xlane.f32.xlu0 %v2587_v2 }
 0x552   :  { %1335 = vmax.xlane.f32.xlu1 %v2590_v4 }
 0x559   :  { %v1796_v41 = vpop.f32.mrb[36].mxu1 }
 0x55a   :  { %v1302_v5 = vpop.f32.mrb[37].mxu1  ;;  %v2599_v54 = vadd.f32 %v1796_v41, %v1581_v36 }
 0x55b   :  { %v2594_v7 = vadd.f32 %v1581_v36, %v1302_v5  ;;  %v1797_v55 = vpop.f32.mrb[38].mxu1 }
 0x55c   :  { %v1305_v43 = vpop.f32.mrb[39].mxu1  ;;  %v2602_v40 = vadd.f32 %v1797_v55, %v1581_v36 }
 0x55d   :  { %v2596_v50 = vadd.f32 %v1581_v36, %v1305_v43  ;;  %1341 = vmax.xlane.f32.xlu0 %v2594_v7 }
 0x55f   :  { %1343 = vmax.xlane.f32.xlu1 %v2596_v50 }
 0x561   :  { %1345 = vmax.xlane.f32.xlu0 %v2599_v54 }
 0x563   :  { %1347 = vmax.xlane.f32.xlu1 %v2602_v40 }
 0x5bb   :  { %v2606_v44 = vpop.xlane.xlu0 %1321 }
 0x5bc   :  { %v1351_v32 = vsub.f32 %v2558_v38, %v2606_v44 }
 0x5bd   :  { %v2610_v9 = vpop.xlane.xlu1 %1323 }
 0x5be   :  { %v1369_v35 = vmul.f32 1.442695, %v1351_v32  ;;  %v1352_v11 = vsub.f32 %v2560_v49, %v2610_v9 }
 0x5bf   :  { %v2614_v10 = vpop.xlane.xlu0 %1317 }
 0x5c0   :  { %1920 = vpow2.f32 %v1369_v35  ;;  %v1371_v12 = vmul.f32 1.442695, %v1352_v11  ;;  %v1349_v14 = vsub.f32 %v2563_v52, %v2614_v10 }
 0x5c1   :  { %v2618_v19 = vpop.xlane.xlu1 %1319 }
 0x5c2   :  { %1922 = vpow2.f32 %v1371_v12  ;;  %v1365_v51 = vmul.f32 1.442695, %v1349_v14  ;;  %v1350_v20 = vsub.f32 %v2566_v39, %v2618_v19 }
 0x5c4   :  { %1924 = vpow2.f32 %v1365_v51  ;;  %v1367_v6 = vmul.f32 1.442695, %v1350_v20 }
 0x5c6   :  { %1926 = vpow2.f32 %v1367_v6 }
 0x5c9   :  { %v2622_v8 = vpop.xlane.xlu0 %1329 }
 0x5ca   :  { %v1921_v60 = vpop.eup %1920  ;;  %v1355_v62 = vsub.f32 %v2570_v25, %v2622_v8 }
 0x5cb   :  { %v2626_v56 = vpop.xlane.xlu1 %1331  ;;  %1401 = vadd.xlane.f32.xlu0 %v1921_v60 }
 0x5cc   :  { %v1923_v24 = vpop.eup %1922  ;;  %v1377_v33 = vmul.f32 1.442695, %v1355_v62  ;;  %v1356_v21 = vsub.f32 %v2572_v48, %v2626_v56 }
 0x5cd   :  { %v2630_v15 = vpop.xlane.xlu0 %1325  ;;  %1403 = vadd.xlane.f32.xlu1 %v1923_v24 }
 0x5ce   :  { %v1925_v27 = vpop.eup %1924  ;;  %1928 = vpow2.f32 %v1377_v33  ;;  %v1379_v29 = vmul.f32 1.442695, %v1356_v21  ;;  %v1353_v59 = vsub.f32 %v2575_v53, %v2630_v15 }
 0x5cf   :  { %v2634_v30 = vpop.xlane.xlu1 %1327  ;;  %1397 = vadd.xlane.f32.xlu0 %v1925_v27 }
 0x5d0   :  { %v1927_v31 = vpop.eup %1926  ;;  %1930 = vpow2.f32 %v1379_v29  ;;  %v1373_v26 = vmul.f32 1.442695, %v1353_v59  ;;  %v1354_v28 = vsub.f32 %v2578_v57, %v2634_v30 }
 0x5d1   :  { %1399 = vadd.xlane.f32.xlu1 %v1927_v31 }
 0x5d2   :  { %1932 = vpow2.f32 %v1373_v26  ;;  %v1375_v16 = vmul.f32 1.442695, %v1354_v28 }
 0x5d4   :  { %1934 = vpow2.f32 %v1375_v16 }
 0x5d8   :  { %v1929_v18 = vpop.eup %1928 }
 0x5d9   :  { %v2638_v34 = vpop.xlane.xlu0 %1337  ;;  %1409 = vadd.xlane.f32.xlu0 %v1929_v18 }
 0x5da   :  { %v1931_v63 = vpop.eup %1930  ;;  %v1359_v36 = vsub.f32 %v2582_v58, %v2638_v34 }
 0x5db   :  { %v2642_v23 = vpop.xlane.xlu1 %1339  ;;  %1411 = vadd.xlane.f32.xlu1 %v1931_v63 }
 0x5dc   :  { %v1933_v22 = vpop.eup %1932  ;;  %v1385_v42 = vmul.f32 1.442695, %v1359_v36  ;;  %v1360_v37 = vsub.f32 %v2584_v17, %v2642_v23 }
 0x5dd   :  { %v2646_v45 = vpop.xlane.xlu0 %1333  ;;  %1405 = vadd.xlane.f32.xlu0 %v1933_v22 }
 0x5de   :  { %v1935_v46 = vpop.eup %1934  ;;  %1936 = vpow2.f32 %v1385_v42  ;;  %v1387_v47 = vmul.f32 1.442695, %v1360_v37  ;;  %v1357_v3 = vsub.f32 %v2587_v2, %v2646_v45 }
 0x5df   :  { %v2650_v13 = vpop.xlane.xlu1 %1335  ;;  %1407 = vadd.xlane.f32.xlu1 %v1935_v46 }
 0x5e0   :  { %1938 = vpow2.f32 %v1387_v47  ;;  %v1381_v61 = vmul.f32 1.442695, %v1357_v3  ;;  %v1358_v0 = vsub.f32 %v2590_v4, %v2650_v13 }
 0x5e2   :  { %1940 = vpow2.f32 %v1381_v61  ;;  %v1383_v1 = vmul.f32 1.442695, %v1358_v0 }
 0x5e4   :  { %1942 = vpow2.f32 %v1383_v1 }
 0x5e8   :  { %v1937_v41 = vpop.eup %1936 }
 0x5e9   :  { %1417 = vadd.xlane.f32.xlu0 %v1937_v41 }
 0x5ea   :  { %v1939_v5 = vpop.eup %1938  ;;  %v2654_v55 = vpop.xlane.xlu0 %1341 }
 0x5eb   :  { %v1361_v43 = vsub.f32 %v2594_v7, %v2654_v55  ;;  %1419 = vadd.xlane.f32.xlu1 %v1939_v5 }
 0x5ec   :  { %v1941_v32 = vpop.eup %1940  ;;  %v2658_v35 = vpop.xlane.xlu1 %1343 }
 0x5ed   :  { %v1389_v11 = vmul.f32 1.442695, %v1361_v43  ;;  %v1362_v12 = vsub.f32 %v2596_v50, %v2658_v35  ;;  %1413 = vadd.xlane.f32.xlu0 %v1941_v32 }
 0x5ee   :  { %v1943_v14 = vpop.eup %1942  ;;  %v2662_v51 = vpop.xlane.xlu0 %1345 }
 0x5ef   :  { %1944 = vpow2.f32 %v1389_v11  ;;  %v1391_v20 = vmul.f32 1.442695, %v1362_v12  ;;  %v1363_v6 = vsub.f32 %v2599_v54, %v2662_v51  ;;  %1415 = vadd.xlane.f32.xlu1 %v1943_v14 }
 0x5f0   :  { %v2666_v60 = vpop.xlane.xlu1 %1347 }
 0x5f1   :  { %1946 = vpow2.f32 %v1391_v20  ;;  %v1393_v62 = vmul.f32 1.442695, %v1363_v6  ;;  %v1364_v24 = vsub.f32 %v2602_v40, %v2666_v60 }
 0x5f3   :  { %1948 = vpow2.f32 %v1393_v62  ;;  %v1395_v33 = vmul.f32 1.442695, %v1364_v24 }
 0x5f5   :  { %1950 = vpow2.f32 %v1395_v33 }
 0x5f9   :  { %v1945_v21 = vpop.eup %1944 }
 0x5fa   :  { %1421 = vadd.xlane.f32.xlu0 %v1945_v21 }
 0x5fb   :  { %v1947_v27 = vpop.eup %1946 }
 0x5fc   :  { %1423 = vadd.xlane.f32.xlu1 %v1947_v27 }
 0x5fd   :  { %v1949_v29 = vpop.eup %1948 }
 0x5fe   :  { %1425 = vadd.xlane.f32.xlu0 %v1949_v29 }
 0x5ff   :  { %v1951_v59 = vpop.eup %1950 }
 0x600   :  { %1427 = vadd.xlane.f32.xlu1 %v1951_v59 }
 0x658   :  { %v1402_v31 = vpop.xlane.xlu0 %1401 }
 0x659   :  { %1952 = vlog2.f32 %v1402_v31 }
 0x65a   :  { %v1404_v26 = vpop.xlane.xlu1 %1403 }
 0x65b   :  { %1954 = vlog2.f32 %v1404_v26 }
 0x65c   :  { %v1398_v28 = vpop.xlane.xlu0 %1397 }
 0x65d   :  { %1956 = vlog2.f32 %v1398_v28 }
 0x65e   :  { %v1400_v16 = vpop.xlane.xlu1 %1399 }
 0x65f   :  { %1958 = vlog2.f32 %v1400_v16 }
 0x663   :  { %v1953_v18 = vpop.eup %1952 }
 0x664   :  { %v1434_v63 = vmul.f32 0.6931472, %v1953_v18 }
 0x665   :  { %v1955_v36 = vpop.eup %1954 }
 0x666   :  { %v1463_v22 = vadd.f32 %v1434_v63, %v2606_v44  ;;  %v1436_v42 = vmul.f32 0.6931472, %v1955_v36  ;;  %v1410_v37 = vpop.xlane.xlu0 %1409 }
 0x667   :  { %v1957_v46 = vpop.eup %1956  ;;  %1960 = vlog2.f32 %v1410_v37 }
 0x668   :  { %v1479_v47 = vsub.f32 %v2558_v38, %v1463_v22  ;;  %v1464_v3 = vadd.f32 %v1436_v42, %v2610_v9  ;;  %v1430_v61 = vmul.f32 0.6931472, %v1957_v46  ;;  %v1412_v0 = vpop.xlane.xlu1 %1411 }
 0x669   :  { %v1959_v1 = vpop.eup %1958  ;;  %1962 = vlog2.f32 %v1412_v0 }
 0x66a   :  { %1495 = vst [vmem:[#allocation12 + $0x10] sm:$0xff] %v1479_v47  ;;  %v1480_v41 = vsub.f32 %v2560_v49, %v1464_v3  ;;  %v1461_v5 = vadd.f32 %v1430_v61, %v2614_v10  ;;  %v1432_v43 = vmul.f32 0.6931472, %v1959_v1  ;;  %v1406_v32 = vpop.xlane.xlu0 %1405 }
 0x66b   :  { %1964 = vlog2.f32 %v1406_v32 }
 0x66c   :  { %1496 = vst [vmem:[#allocation12 + $0x18] sm:$0xff] %v1480_v41  ;;  %v1477_v44 = vsub.f32 %v2563_v52, %v1461_v5  ;;  %v1462_v11 = vadd.f32 %v1432_v43, %v2618_v19  ;;  %v1408_v38 = vpop.xlane.xlu1 %1407 }
 0x66d   :  { %1966 = vlog2.f32 %v1408_v38 }
 0x66e   :  { %1493 = vst [vmem:[#allocation12] sm:$0xff] %v1477_v44  ;;  %v1478_v9 = vsub.f32 %v2566_v39, %v1462_v11 }
 0x670   :  { %1494 = vst [vmem:[#allocation12 + $0x8] sm:$0xff] %v1478_v9 }
 0x671   :  { %v1961_v12 = vpop.eup %1960 }
 0x672   :  { %v1442_v14 = vmul.f32 0.6931472, %v1961_v12 }
 0x673   :  { %v1963_v20 = vpop.eup %1962 }
 0x674   :  { %v1467_v49 = vadd.f32 %v1442_v14, %v2622_v8  ;;  %v1444_v10 = vmul.f32 0.6931472, %v1963_v20 }
 0x675   :  { %v1965_v6 = vpop.eup %1964 }
 0x676   :  { %v1483_v62 = vsub.f32 %v2570_v25, %v1467_v49  ;;  %v1468_v24 = vadd.f32 %v1444_v10, %v2626_v56  ;;  %v1438_v52 = vmul.f32 0.6931472, %v1965_v6  ;;  %v1418_v33 = vpop.xlane.xlu0 %1417 }
 0x677   :  { %v1967_v19 = vpop.eup %1966  ;;  %1968 = vlog2.f32 %v1418_v33 }
 0x678   :  { %1499 = vst [vmem:[#allocation12 + $0x30] sm:$0xff] %v1483_v62  ;;  %v1484_v21 = vsub.f32 %v2572_v48, %v1468_v24  ;;  %v1465_v39 = vadd.f32 %v1438_v52, %v2630_v15  ;;  %v1440_v27 = vmul.f32 0.6931472, %v1967_v19  ;;  %v1420_v29 = vpop.xlane.xlu1 %1419 }
 0x679   :  { %1970 = vlog2.f32 %v1420_v29 }
 0x67a   :  { %1500 = vst [vmem:[#allocation12 + $0x38] sm:$0xff] %v1484_v21  ;;  %v1481_v8 = vsub.f32 %v2575_v53, %v1465_v39  ;;  %v1466_v59 = vadd.f32 %v1440_v27, %v2634_v30  ;;  %v1414_v25 = vpop.xlane.xlu0 %1413 }
 0x67b   :  { %1972 = vlog2.f32 %v1414_v25 }
 0x67c   :  { %1497 = vst [vmem:[#allocation12 + $0x20] sm:$0xff] %v1481_v8  ;;  %v1482_v56 = vsub.f32 %v2578_v57, %v1466_v59  ;;  %v1416_v31 = vpop.xlane.xlu1 %1415 }
 0x67d   :  { %1974 = vlog2.f32 %v1416_v31 }
 0x67e   :  { %1498 = vst [vmem:[#allocation12 + $0x28] sm:$0xff] %v1482_v56 }
 0x681   :  { %v1969_v26 = vpop.eup %1968 }
 0x682   :  { %v1450_v48 = vmul.f32 0.6931472, %v1969_v26 }
 0x683   :  { %v1971_v28 = vpop.eup %1970 }
 0x684   :  { %v1471_v15 = vadd.f32 %v1450_v48, %v2638_v34  ;;  %v1452_v16 = vmul.f32 0.6931472, %v1971_v28 }
 0x685   :  { %v1973_v18 = vpop.eup %1972 }
 0x686   :  { %v1487_v63 = vsub.f32 %v2582_v58, %v1471_v15  ;;  %v1472_v53 = vadd.f32 %v1452_v16, %v2642_v23  ;;  %v1446_v30 = vmul.f32 0.6931472, %v1973_v18 }
 0x687   :  { %v1975_v36 = vpop.eup %1974  ;;  %v1422_v22 = vpop.xlane.xlu0 %1421 }
 0x688   :  { %1503 = vst [vmem:[#allocation12 + $0x50] sm:$0xff] %v1487_v63  ;;  %v1488_v57 = vsub.f32 %v2584_v17, %v1472_v53  ;;  %v1469_v42 = vadd.f32 %v1446_v30, %v2646_v45  ;;  %v1448_v37 = vmul.f32 0.6931472, %v1975_v36  ;;  %1976 = vlog2.f32 %v1422_v22 }
 0x689   :  { %v1424_v46 = vpop.xlane.xlu1 %1423 }
 0x68a   :  { %1504 = vst [vmem:[#allocation12 + $0x58] sm:$0xff] %v1488_v57  ;;  %v1485_v34 = vsub.f32 %v2587_v2, %v1469_v42  ;;  %v1470_v47 = vadd.f32 %v1448_v37, %v2650_v13  ;;  %1978 = vlog2.f32 %v1424_v46 }
 0x68b   :  { %v1426_v58 = vpop.xlane.xlu0 %1425 }
 0x68c   :  { %1501 = vst [vmem:[#allocation12 + $0x40] sm:$0xff] %v1485_v34  ;;  %v1486_v23 = vsub.f32 %v2590_v4, %v1470_v47  ;;  %1980 = vlog2.f32 %v1426_v58 }
 0x68d   :  { %v1428_v3 = vpop.xlane.xlu1 %1427 }
 0x68e   :  { %1502 = vst [vmem:[#allocation12 + $0x48] sm:$0xff] %v1486_v23  ;;  %1982 = vlog2.f32 %v1428_v3 }
 0x692   :  { %v1977_v17 = vpop.eup %1976 }
 0x693   :  { %v1454_v61 = vmul.f32 0.6931472, %v1977_v17 }
 0x694   :  { %v1979_v45 = vpop.eup %1978 }
 0x695   :  { %v1473_v0 = vadd.f32 %v1454_v61, %v2654_v55  ;;  %v1456_v1 = vmul.f32 0.6931472, %v1979_v45 }
 0x696   :  { %v1981_v41 = vpop.eup %1980 }
 0x697   :  { %v1489_v2 = vsub.f32 %v2594_v7, %v1473_v0  ;;  %v1474_v13 = vadd.f32 %v1456_v1, %v2658_v35  ;;  %v1458_v5 = vmul.f32 0.6931472, %v1981_v41 }
 0x698   :  { %v1983_v43 = vpop.eup %1982 }
 0x699   :  { %1505 = vst [vmem:[#allocation12 + $0x60] sm:$0xff] %v1489_v2  ;;  %v1490_v4 = vsub.f32 %v2596_v50, %v1474_v13  ;;  %v1475_v32 = vadd.f32 %v1458_v5, %v2662_v51  ;;  %v1460_v44 = vmul.f32 0.6931472, %v1983_v43 }
 0x69b   :  { %1506 = vst [vmem:[#allocation12 + $0x68] sm:$0xff] %v1490_v4  ;;  %v1491_v11 = vsub.f32 %v2599_v54, %v1475_v32  ;;  %v1476_v55 = vadd.f32 %v1460_v44, %v2666_v60 }
 0x69d   :  { %1507 = vst [vmem:[#allocation12 + $0x70] sm:$0xff] %v1491_v11  ;;  %v1492_v7 = vsub.f32 %v2602_v40, %v1476_v55 }
 0x69f   :  { %1508 = vst [vmem:[#allocation12 + $0x78] sm:$0xff] %v1492_v7 }
 0x6a0   :  { %2105 = shalt.err (!%p2102_p2)
}
 0x6a1   :  { %s2106_s14 = scalar_lea.hbm %s2728_s11, 2048 }
 0x6a2   :  { %p2107_p3 = scmp.ne.s32.totalorder %s2728_s11, %s2106_s14  ;;  %p2110_p4 = scmp.lt.u32.totalorder %s2106_s14, %s2728_s11 }
 0x6a4   :  { %p2112_p5 = pnand %p2110_p4, %p2107_p3 }
 0x6a6   :  { %2115 = shalt.err (!%p2112_p5)
}
 0x6a7   :  { %1520 = dma.vmem_to_hbm [thread:$0]  %s1515_s30, 2048, %s2728_s11, [#allocation5], %s2129_s7, %s2129_s7, %s2130_s13  }
 0x6a8   :  { %2122 = dma.done.wait [#allocation5], 2048  }
 0x6a9   :  { %2123 = vsyncadd [#allocation5], 4294965248 }
 0x6aa   :  { %1524 = vsyncpa [#allocation4], 1 }
 0x6ab   :  { %1525 = vsyncpa [#allocation7], 1 }
 0x6ac   :  { %1526 = vsyncpa [#allocation10], 1 }
 0x6ad   :  { %1527 = vsyncpa [#allocation5], 1 }

</bundles_post_ra>
